<compile_context>
chip_gen: v7x
topology: tpu7x:2x2x1
jax: 0.10.0
libtpu: 0.0.40
codegen_flags: <defaults>
</compile_context>

<pallas_src>
import functools

import jax
import jax.numpy as jnp
from jax import lax
from jax.experimental import pallas as pl
from jax.experimental.pallas import tpu as pltpu


# -----------------------------------------------------------------------------
# Kernel: one batch tile of stacked [premise ; hypothesis] rows.
#   gate layout per direction (lanes): [ i | f | o | g ]  (sigmoid gates contiguous)
#   input-projection layout (lanes):   [ fwd(i,f,o,g) | bwd(i,f,o,g) ]  -> dense [E, 8H]
# -----------------------------------------------------------------------------
def bilstm_maxpool_mlp_kernel(
    x_ref,        # [T, 2bt, E]   bf16  rows [:bt]=premise, [bt:]=hypothesis
    wih_ref,      # [E, 8H]       bf16  dense packed input weights (fwd | bwd)
    bg_ref,       # [1, 8H]       f32   packed biases
    whf_ref,      # [H, 4H]       bf16  recurrent weights, forward direction
    whb_ref,      # [H, 4H]       bf16  recurrent weights, backward direction
    w1_ref,       # [8H, H]       bf16  linear_1
    b1_ref,       # [1, H]        f32
    w2_ref,       # [9H, H]       bf16  linear_2
    b2_ref,       # [1, H]        f32
    w3_ref,       # [H, Cp]       bf16  linear_3 (class dim padded to 128 lanes)
    b3_ref,       # [1, Cp]       f32
    out_ref,      # [bt, Cp]      f32
    gxf_ref,      # [T, 2bt, 4H]  f32 scratch: fwd gate pre-activations per step
    gxb_ref,      # [T, 2bt, 4H]  f32 scratch: bwd gate pre-activations per step
    *, nt, nbt):
  b2t = x_ref.shape[1]            # 2 * bt (stacked premise + hypothesis rows)
  ne = x_ref.shape[2]
  nh = whf_ref.shape[0]           # hidden size H
  h2, h3, h4 = 2 * nh, 3 * nh, 4 * nh

  def bdot(a, w):                 # bf16 MXU matmul, f32 accumulation
    return jnp.dot(a.astype(jnp.bfloat16), w, preferred_element_type=jnp.float32)

  # ---- hoisted input projection: one dense bf16 matmul, bias folded in, then
  #      split by direction into the per-step scratches (off the critical path). ----
  x = x_ref[...].reshape(nt * b2t, ne)                              # bf16
  gx = jnp.dot(x, wih_ref[...], preferred_element_type=jnp.float32) + bg_ref[...]
  gx = gx.reshape(nt, b2t, 8 * nh)
  gxf_ref[...] = gx[:, :, :h4]
  gxb_ref[...] = gx[:, :, h4:]
  # TODO(synk): for very long T / huge batch tiles, stream gx per time step from HBM
  # with a 2-deep make_async_copy double buffer instead of a full VMEM scratch.

  whf = whf_ref[...]
  whb = whb_ref[...]

  def step(gx_t, h, c, hmax, whh):
    gates = gx_t + bdot(h, whh)                 # [2bt, 4H]
    sig = jax.nn.sigmoid(gates[:, :h3])         # i,f,o — 3H lanes of EUP work
    g = jnp.tanh(gates[:, h3:])                 # g     — H lanes
    c = sig[:, nh:h2] * c + sig[:, :nh] * g
    h = sig[:, h2:h3] * jnp.tanh(c)
    return h, c, jnp.maximum(hmax, h)

  def body(t, carry):
    hf, cf, mf, hb, cb, mb = carry
    # Forward and backward recurrences are independent within a step: their matmuls
    # and gate chains interleave, filling VPU/EUP slots during MXU latency.
    hf, cf, mf = step(gxf_ref[t], hf, cf, mf, whf)
    hb, cb, mb = step(gxb_ref[nt - 1 - t], hb, cb, mb, whb)
    return hf, cf, mf, hb, cb, mb

  zero = jnp.zeros((b2t, nh), jnp.float32)
  ninf = jnp.full((b2t, nh), -jnp.inf, jnp.float32)
  init = (zero, zero, ninf, zero, zero, ninf)
  _, _, mf, _, _, mb = lax.fori_loop(0, nt, body, init, unroll=min(nt, 8))

  # Encodings: [max(h_fwd) | max(h_bwd)]; premise rows [:bt], hypothesis rows [bt:]
  # are sublane-aligned static slices (no permutation matmul).
  enc = jnp.concatenate([mf, mb], axis=1)       # [2bt, 2H]
  p_enc = enc[:nbt]
  h_enc = enc[nbt:]
  d_enc = p_enc - h_enc
  m_enc = p_enc * h_enc

  # ---- MLP head with split matmuls on 2H row blocks (no 8H / 9H concats). ----
  w1 = w1_ref[...]
  lin1 = jax.nn.relu(
      bdot(p_enc, w1[0 * h2:1 * h2]) + bdot(h_enc, w1[1 * h2:2 * h2]) +
      bdot(d_enc, w1[2 * h2:3 * h2]) + bdot(m_enc, w1[3 * h2:4 * h2]) +
      b1_ref[...])                              # [bt, H]

  w2 = w2_ref[...]
  lin2 = jax.nn.relu(
      bdot(p_enc, w2[0 * h2:1 * h2]) + bdot(h_enc, w2[1 * h2:2 * h2]) +
      bdot(d_enc, w2[2 * h2:3 * h2]) + bdot(m_enc, w2[3 * h2:4 * h2]) +
      bdot(lin1, w2[4 * h2:4 * h2 + nh]) + b2_ref[...])   # [bt, H]

  # Lane-dense [bt, 128] output store; wrapper slices [:B, :C].
  out_ref[...] = bdot(lin2, w3_ref[...]) + b3_ref[...]


# -----------------------------------------------------------------------------
# Wrapper: embedding lookup + weight packing (one-time XLA glue) + batch-gridded
# pallas_call.
# -----------------------------------------------------------------------------
def _round_up(v, m):
  return ((v + m - 1) // m) * m


def _reorder_gate_cols(w, nh):
  """Permute gate column blocks (i, f, g, o) -> (i, f, o, g)."""
  r = w.reshape(w.shape[0], 4, nh)
  return jnp.concatenate([r[:, 0], r[:, 1], r[:, 3], r[:, 2]], axis=-1)


@functools.partial(jax.jit, static_argnames=("batch_tile",))
def bilstm_maxpooling_forward(premise_tok, hypo_tok, params, *, batch_tile=128):
  emb = params["embedding"]
  B, T = premise_tok.shape
  E = emb.shape[1]
  H = params["whh_f"].shape[0]
  C = params["w3"].shape[1]
  Cp = _round_up(max(C, 128), 128)

  # Batch tiling: `bt` premise/hypothesis pairs per grid step (multiple of 8).
  # v6e can afford larger tiles (128 MiB VMEM, 256-wide MXU); shrink on v7x (64 MiB).
  bt = _round_up(min(batch_tile, _round_up(B, 8)), 8)
  nb_tiles = -(-B // bt)
  Bt = nb_tiles * bt

  # Embedding lookup (XLA glue), per-side zero padding, and per-tile stacking so each
  # grid tile holds its premise rows followed by its matching hypothesis rows.
  xp = jnp.take(emb, premise_tok, axis=0)                      # [B, T, E]
  xh = jnp.take(emb, hypo_tok, axis=0)
  xp = jnp.pad(xp, ((0, Bt - B), (0, 0), (0, 0))).reshape(nb_tiles, bt, T, E)
  xh = jnp.pad(xh, ((0, Bt - B), (0, 0), (0, 0))).reshape(nb_tiles, bt, T, E)
  x = jnp.concatenate([xp, xh], axis=1)                        # [nb, 2bt, T, E]
  x = jnp.transpose(x, (2, 0, 1, 3)).reshape(T, nb_tiles * 2 * bt, E)
  x = x.astype(jnp.bfloat16)                                   # bf16 MXU operand

  # LSTM weights: gate columns (i,f,g,o)->(i,f,o,g); input weights packed dense
  # [fwd | bwd]; recurrent weights dense per direction.
  wih = jnp.concatenate([_reorder_gate_cols(params["wih_f"], H),
                         _reorder_gate_cols(params["wih_b"], H)],
                        axis=1).astype(jnp.bfloat16)            # [E, 8H]
  bg = jnp.concatenate([_reorder_gate_cols(params["b_f"], H),
                        _reorder_gate_cols(params["b_b"], H)], axis=1)   # [1, 8H]
  whf = _reorder_gate_cols(params["whh_f"], H).astype(jnp.bfloat16)      # [H, 4H]
  whb = _reorder_gate_cols(params["whh_b"], H).astype(jnp.bfloat16)      # [H, 4H]

  w1 = params["w1"].astype(jnp.bfloat16)                                 # [8H, H]
  w2 = params["w2"].astype(jnp.bfloat16)                                 # [9H, H]
  w3 = (jnp.zeros((H, Cp), jnp.float32).at[:, :C]
        .set(params["w3"]).astype(jnp.bfloat16))                         # [H, Cp]
  b3 = jnp.zeros((1, Cp), jnp.float32).at[:, :C].set(params["b3"])       # [1, Cp]

  # Scoped-VMEM limit sized from the actual resident buffers (with headroom).
  wbytes = ((wih.size + whf.size + whb.size + w1.size + w2.size + w3.size) * 2 +
            (bg.size + b3.size + params["b1"].size + params["b2"].size) * 4)
  blkbytes = (2 * T * 2 * bt * E * 2            # x block (double-buffered, bf16)
              + 2 * bt * Cp * 4                 # out block
              + 2 * T * 2 * bt * 4 * H * 4      # gx scratches (f32)
              + T * 2 * bt * 8 * H * 4)         # projection result live value
  vmem_limit = int(min(max(2 * (wbytes + blkbytes), 32 * 1024 * 1024),
                       100 * 1024 * 1024))

  def whole(a):
    return pl.BlockSpec(a.shape, lambda g, nd=a.ndim: (0,) * nd)

  kernel = functools.partial(bilstm_maxpool_mlp_kernel, nt=T, nbt=bt)
  args = (x, wih, bg, whf, whb, w1, params["b1"], w2, params["b2"], w3, b3)

  out = pl.pallas_call(
      kernel,
      out_shape=jax.ShapeDtypeStruct((Bt, Cp), jnp.float32),
      grid=(nb_tiles,),
      in_specs=[
          pl.BlockSpec((T, 2 * bt, E), lambda g: (0, g, 0)),
          whole(wih), whole(bg), whole(whf), whole(whb),
          whole(w1), whole(params["b1"]), whole(w2), whole(params["b2"]),
          whole(w3), whole(b3),
      ],
      out_specs=pl.BlockSpec((bt, Cp), lambda g: (g, 0)),
      scratch_shapes=[
          pltpu.VMEM((T, 2 * bt, 4 * H), jnp.float32),
          pltpu.VMEM((T, 2 * bt, 4 * H), jnp.float32),
      ],
      compiler_params=pltpu.CompilerParams(
          dimension_semantics=("parallel",),
          vmem_limit_bytes=vmem_limit),
  )(*args)
  return out[:B, :C]


# -----------------------------------------------------------------------------
# Pure-JAX reference (mirrors torch.nn.LSTM / Linear semantics) for validation.
# -----------------------------------------------------------------------------
def reference_forward(premise_tok, hypo_tok, p):
  emb = p["embedding"]
  xp = jnp.take(emb, premise_tok, axis=0)   # [B, T, E]
  xh = jnp.take(emb, hypo_tok, axis=0)

  def lstm_maxpool(x, wih, whh, b, reverse):
    B, T, E = x.shape
    H = whh.shape[0]
    h = jnp.zeros((B, H), jnp.float32)
    c = jnp.zeros((B, H), jnp.float32)
    hmax = jnp.full((B, H), -jnp.inf, jnp.float32)
    ts = range(T - 1, -1, -1) if reverse else range(T)
    for t in ts:
      gates = x[:, t, :] @ wih + h @ whh + b
      i_g = jax.nn.sigmoid(gates[:, 0 * H:1 * H])
      f_g = jax.nn.sigmoid(gates[:, 1 * H:2 * H])
      g_g = jnp.tanh(gates[:, 2 * H:3 * H])
      o_g = jax.nn.sigmoid(gates[:, 3 * H:4 * H])
      c = f_g * c + i_g * g_g
      h = o_g * jnp.tanh(c)
      hmax = jnp.maximum(hmax, h)
    return hmax

  def encode(x):
    return jnp.concatenate(
        [lstm_maxpool(x, p["wih_f"], p["whh_f"], p["b_f"], False),
         lstm_maxpool(x, p["wih_b"], p["whh_b"], p["b_b"], True)], axis=1)

  p_enc, h_enc = encode(xp), encode(xh)
  lin_input = jnp.concatenate(
      [p_enc, h_enc, p_enc - h_enc, p_enc * h_enc], axis=1)
  lin_output = jax.nn.relu(lin_input @ p["w1"] + p["b1"])
  lin_input_2 = jnp.concatenate([lin_input, lin_output], axis=1)
  lin_output_2 = jax.nn.relu(lin_input_2 @ p["w2"] + p["b2"])
  return lin_output_2 @ p["w3"] + p["b3"]


# -----------------------------------------------------------------------------
# Deterministic parameter construction + small run.
# -----------------------------------------------------------------------------
def make_params(key, vocab, emb_dim, hidden, n_classes):
  ks = jax.random.split(key, 16)
  s = 0.1
  return {
      "embedding": jax.random.normal(ks[0], (vocab, emb_dim), jnp.float32),
      # bidirectional LSTM, gate order (i, f, g, o); biases fold b_ih + b_hh.
      "wih_f": s * jax.random.normal(ks[1], (emb_dim, 4 * hidden), jnp.float32),
      "whh_f": s * jax.random.normal(ks[2], (hidden, 4 * hidden), jnp.float32),
      "b_f":   s * jax.random.normal(ks[3], (1, 4 * hidden), jnp.float32),
      "wih_b": s * jax.random.normal(ks[4], (emb_dim, 4 * hidden), jnp.float32),
      "whh_b": s * jax.random.normal(ks[5], (hidden, 4 * hidden), jnp.float32),
      "b_b":   s * jax.random.normal(ks[6], (1, 4 * hidden), jnp.float32),
      # MLP head.
      "w1": s * jax.random.normal(ks[7], (8 * hidden, hidden), jnp.float32),
      "b1": s * jax.random.normal(ks[8], (1, hidden), jnp.float32),
      "w2": s * jax.random.normal(ks[9], (9 * hidden, hidden), jnp.float32),
      "b2": s * jax.random.normal(ks[10], (1, hidden), jnp.float32),
      "w3": s * jax.random.normal(ks[11], (hidden, n_classes), jnp.float32),
      "b3": s * jax.random.normal(ks[12], (1, n_classes), jnp.float32),
  }


if __name__ == "__main__":
  # Small shapes; batch_tile=8 forces a 2-step "parallel" batch grid plus padding,
  # exercising the production tiling path.
  B, T, E, H, C, V = 12, 8, 32, 32, 3, 50

  key = jax.random.PRNGKey(0)
  k_par, k_p, k_h = jax.random.split(key, 3)
  params = make_params(k_par, V, E, H, C)

  premise = jax.random.randint(k_p, (B, T), 0, V, dtype=jnp.int32)
  hypo = jax.random.randint(k_h, (B, T), 0, V, dtype=jnp.int32)

  out = bilstm_maxpooling_forward(premise, hypo, params, batch_tile=8)
  out = jax.block_until_ready(out)

  ref = reference_forward(premise, hypo, params)
  assert out.shape == (B, C)
  assert jnp.all(jnp.isfinite(out))
  # bf16 MXU operands (input projection, recurrent & head weights) with f32
  # accumulation -> looser tolerance vs the pure-f32 reference.
  assert jnp.allclose(out, ref, atol=5e-2, rtol=5e-2), (out, ref)

  print("KERNEL_OK")
</pallas_src>

<mosaic_0001>
module attributes {stable_mosaic.version = 11 : i64} {
  func.func @bilstm_maxpool_mlp_kernel(%arg0: i32, %arg1: memref<8x16x32xbf16, #tpu.memory_space<vmem>>, %arg2: memref<32x256xbf16, #tpu.memory_space<vmem>>, %arg3: memref<1x256xf32, #tpu.memory_space<vmem>>, %arg4: memref<32x128xbf16, #tpu.memory_space<vmem>>, %arg5: memref<32x128xbf16, #tpu.memory_space<vmem>>, %arg6: memref<256x32xbf16, #tpu.memory_space<vmem>>, %arg7: memref<1x32xf32, #tpu.memory_space<vmem>>, %arg8: memref<288x32xbf16, #tpu.memory_space<vmem>>, %arg9: memref<1x32xf32, #tpu.memory_space<vmem>>, %arg10: memref<32x128xbf16, #tpu.memory_space<vmem>>, %arg11: memref<1x128xf32, #tpu.memory_space<vmem>>, %arg12: memref<8x128xf32, #tpu.memory_space<vmem>>, %arg13: memref<8x16x128xf32, #tpu.memory_space<vmem>>, %arg14: memref<8x16x128xf32, #tpu.memory_space<vmem>>) attributes {dimension_semantics = [#tpu.dimension_semantics<parallel>], iteration_bounds = array<i64: 2>, scalar_prefetch = 0 : i64, scratch_operands = 2 : i64, tpu.core_type = #tpu.core_type<tc>, window_params = [{transform_indices = @transform_0, window_bounds = array<i64: 8, 16, 32>}, {pipeline_mode = #tpu.pipeline_mode<synchronous>, transform_indices = @transform_1, window_bounds = array<i64: 32, 256>}, {pipeline_mode = #tpu.pipeline_mode<synchronous>, transform_indices = @transform_2, window_bounds = array<i64: 1, 256>}, {pipeline_mode = #tpu.pipeline_mode<synchronous>, transform_indices = @transform_3, window_bounds = array<i64: 32, 128>}, {pipeline_mode = #tpu.pipeline_mode<synchronous>, transform_indices = @transform_4, window_bounds = array<i64: 32, 128>}, {pipeline_mode = #tpu.pipeline_mode<synchronous>, transform_indices = @transform_5, window_bounds = array<i64: 256, 32>}, {pipeline_mode = #tpu.pipeline_mode<synchronous>, transform_indices = @transform_6, window_bounds = array<i64: 1, 32>}, {pipeline_mode = #tpu.pipeline_mode<synchronous>, transform_indices = @transform_7, window_bounds = array<i64: 288, 32>}, {pipeline_mode = #tpu.pipeline_mode<synchronous>, transform_indices = @transform_8, window_bounds = array<i64: 1, 32>}, {pipeline_mode = #tpu.pipeline_mode<synchronous>, transform_indices = @transform_9, window_bounds = array<i64: 32, 128>}, {pipeline_mode = #tpu.pipeline_mode<synchronous>, transform_indices = @transform_10, window_bounds = array<i64: 1, 128>}, {transform_indices = @transform_11, window_bounds = array<i64: 8, 128>}]} {
    %c0 = arith.constant 0 : index
    %c0_0 = arith.constant 0 : index
    %c0_1 = arith.constant 0 : index
    %0 = vector.load %arg1[%c0, %c0_0, %c0_1] : memref<8x16x32xbf16, #tpu.memory_space<vmem>>, vector<8x16x32xbf16>
    %1 = vector.shape_cast %0 : vector<8x16x32xbf16> to vector<128x32xbf16>
    %c0_2 = arith.constant 0 : index
    %c0_3 = arith.constant 0 : index
    %2 = vector.load %arg2[%c0_2, %c0_3] : memref<32x256xbf16, #tpu.memory_space<vmem>>, vector<32x256xbf16>
    %cst = arith.constant dense<0.000000e+00> : vector<128x256xf32>
    %3 = tpu.matmul %1, %2, %cst {dimension_numbers = #tpu.dot_dimension_numbers<[1], [0], [0], [1], [0, 0, 1, 1], [], []>} : vector<128x32xbf16>, vector<32x256xbf16>, vector<128x256xf32> -> vector<128x256xf32>
    %c0_4 = arith.constant 0 : index
    %c0_5 = arith.constant 0 : index
    %4 = vector.load %arg3[%c0_4, %c0_5] : memref<1x256xf32, #tpu.memory_space<vmem>>, vector<1x256xf32>
    %5 = vector.broadcast %4 : vector<1x256xf32> to vector<128x256xf32>
    %6 = arith.addf %3, %5 : vector<128x256xf32>
    %7 = vector.shape_cast %6 : vector<128x256xf32> to vector<8x16x256xf32>
    %8 = vector.extract_strided_slice %7 {offsets = [0, 0, 0], sizes = [8, 16, 128], strides = [1, 1, 1]} : vector<8x16x256xf32> to vector<8x16x128xf32>
    %c0_6 = arith.constant 0 : index
    %c0_7 = arith.constant 0 : index
    %c0_8 = arith.constant 0 : index
    %9 = vector.load %arg13[%c0_6, %c0_7, %c0_8] : memref<8x16x128xf32, #tpu.memory_space<vmem>>, vector<8x16x128xf32>
    tpu.vector_store %arg13[%c0_6, %c0_7, %c0_8], %8 {strides = array<i32>} : memref<8x16x128xf32, #tpu.memory_space<vmem>>, vector<8x16x128xf32>,
    %10 = vector.extract_strided_slice %7 {offsets = [0, 0, 128], sizes = [8, 16, 128], strides = [1, 1, 1]} : vector<8x16x256xf32> to vector<8x16x128xf32>
    %c0_9 = arith.constant 0 : index
    %c0_10 = arith.constant 0 : index
    %c0_11 = arith.constant 0 : index
    %11 = vector.load %arg14[%c0_9, %c0_10, %c0_11] : memref<8x16x128xf32, #tpu.memory_space<vmem>>, vector<8x16x128xf32>
    tpu.vector_store %arg14[%c0_9, %c0_10, %c0_11], %10 {strides = array<i32>} : memref<8x16x128xf32, #tpu.memory_space<vmem>>, vector<8x16x128xf32>,
    %c0_12 = arith.constant 0 : index
    %c0_13 = arith.constant 0 : index
    %12 = vector.load %arg4[%c0_12, %c0_13] : memref<32x128xbf16, #tpu.memory_space<vmem>>, vector<32x128xbf16>
    %c0_14 = arith.constant 0 : index
    %c0_15 = arith.constant 0 : index
    %13 = vector.load %arg5[%c0_14, %c0_15] : memref<32x128xbf16, #tpu.memory_space<vmem>>, vector<32x128xbf16>
    %cst_16 = arith.constant 0.000000e+00 : f32
    %14 = vector.broadcast %cst_16 : f32 to vector<16x32xf32>
    %cst_17 = arith.constant 0xFF800000 : f32
    %15 = vector.broadcast %cst_17 : f32 to vector<16x32xf32>
    %c0_i32 = arith.constant 0 : i32
    %16 = arith.index_cast %c0_i32 : i32 to index
    %c0_18 = arith.constant 0 : index
    %c0_19 = arith.constant 0 : index
    %17 = vector.load %arg13[%16, %c0_18, %c0_19] : memref<8x16x128xf32, #tpu.memory_space<vmem>>, vector<1x16x128xf32>
    %18 = vector.shape_cast %17 : vector<1x16x128xf32> to vector<16x128xf32>
    %19 = arith.truncf %14 : vector<16x32xf32> to vector<16x32xbf16>
    %cst_20 = arith.constant dense<0.000000e+00> : vector<16x128xf32>
    %20 = tpu.matmul %19, %12, %cst_20 {dimension_numbers = #tpu.dot_dimension_numbers<[1], [0], [0], [1], [0, 0, 1, 1], [], []>} : vector<16x32xbf16>, vector<32x128xbf16>, vector<16x128xf32> -> vector<16x128xf32>
    %21 = arith.addf %18, %20 : vector<16x128xf32>
    %22 = vector.extract_strided_slice %21 {offsets = [0, 0], sizes = [16, 96], strides = [1, 1]} : vector<16x128xf32> to vector<16x96xf32>
    %23 = arith.negf %22 : vector<16x96xf32>
    %24 = math.exp %23 : vector<16x96xf32>
    %cst_21 = arith.constant 1.000000e+00 : f32
    %25 = vector.broadcast %cst_21 : f32 to vector<16x96xf32>
    %26 = arith.addf %25, %24 : vector<16x96xf32>
    %27 = arith.divf %25, %26 : vector<16x96xf32>
    %28 = vector.extract_strided_slice %21 {offsets = [0, 96], sizes = [16, 32], strides = [1, 1]} : vector<16x128xf32> to vector<16x32xf32>
    %29 = math.tanh %28 : vector<16x32xf32>
    %30 = vector.extract_strided_slice %27 {offsets = [0, 32], sizes = [16, 32], strides = [1, 1]} : vector<16x96xf32> to vector<16x32xf32>
    %31 = arith.mulf %30, %14 : vector<16x32xf32>
    %32 = vector.extract_strided_slice %27 {offsets = [0, 0], sizes = [16, 32], strides = [1, 1]} : vector<16x96xf32> to vector<16x32xf32>
    %33 = arith.mulf %32, %29 : vector<16x32xf32>
    %34 = arith.addf %31, %33 : vector<16x32xf32>
    %35 = vector.extract_strided_slice %27 {offsets = [0, 64], sizes = [16, 32], strides = [1, 1]} : vector<16x96xf32> to vector<16x32xf32>
    %36 = math.tanh %34 : vector<16x32xf32>
    %37 = arith.mulf %35, %36 : vector<16x32xf32>
    %38 = arith.maximumf %15, %37 : vector<16x32xf32>
    %c7_i32 = arith.constant 7 : i32
    %39 = arith.subi %c7_i32, %c0_i32 : i32
    %40 = arith.index_cast %39 : i32 to index
    %c0_22 = arith.constant 0 : index
    %c0_23 = arith.constant 0 : index
    %41 = vector.load %arg14[%40, %c0_22, %c0_23] : memref<8x16x128xf32, #tpu.memory_space<vmem>>, vector<1x16x128xf32>
    %42 = vector.shape_cast %41 : vector<1x16x128xf32> to vector<16x128xf32>
    %43 = arith.truncf %14 : vector<16x32xf32> to vector<16x32xbf16>
    %cst_24 = arith.constant dense<0.000000e+00> : vector<16x128xf32>
    %44 = tpu.matmul %43, %13, %cst_24 {dimension_numbers = #tpu.dot_dimension_numbers<[1], [0], [0], [1], [0, 0, 1, 1], [], []>} : vector<16x32xbf16>, vector<32x128xbf16>, vector<16x128xf32> -> vector<16x128xf32>
    %45 = arith.addf %42, %44 : vector<16x128xf32>
    %46 = vector.extract_strided_slice %45 {offsets = [0, 0], sizes = [16, 96], strides = [1, 1]} : vector<16x128xf32> to vector<16x96xf32>
    %47 = arith.negf %46 : vector<16x96xf32>
    %48 = math.exp %47 : vector<16x96xf32>
    %cst_25 = arith.constant 1.000000e+00 : f32
    %49 = vector.broadcast %cst_25 : f32 to vector<16x96xf32>
    %50 = arith.addf %49, %48 : vector<16x96xf32>
    %51 = arith.divf %49, %50 : vector<16x96xf32>
    %52 = vector.extract_strided_slice %45 {offsets = [0, 96], sizes = [16, 32], strides = [1, 1]} : vector<16x128xf32> to vector<16x32xf32>
    %53 = math.tanh %52 : vector<16x32xf32>
    %54 = vector.extract_strided_slice %51 {offsets = [0, 32], sizes = [16, 32], strides = [1, 1]} : vector<16x96xf32> to vector<16x32xf32>
    %55 = arith.mulf %54, %14 : vector<16x32xf32>
    %56 = vector.extract_strided_slice %51 {offsets = [0, 0], sizes = [16, 32], strides = [1, 1]} : vector<16x96xf32> to vector<16x32xf32>
    %57 = arith.mulf %56, %53 : vector<16x32xf32>
    %58 = arith.addf %55, %57 : vector<16x32xf32>
    %59 = vector.extract_strided_slice %51 {offsets = [0, 64], sizes = [16, 32], strides = [1, 1]} : vector<16x96xf32> to vector<16x32xf32>
    %60 = math.tanh %58 : vector<16x32xf32>
    %61 = arith.mulf %59, %60 : vector<16x32xf32>
    %62 = arith.maximumf %15, %61 : vector<16x32xf32>
    %c1_i32 = arith.constant 1 : i32
    %63 = arith.index_cast %c1_i32 : i32 to index
    %c0_26 = arith.constant 0 : index
    %c0_27 = arith.constant 0 : index
    %64 = vector.load %arg13[%63, %c0_26, %c0_27] : memref<8x16x128xf32, #tpu.memory_space<vmem>>, vector<1x16x128xf32>
    %65 = vector.shape_cast %64 : vector<1x16x128xf32> to vector<16x128xf32>
    %66 = arith.truncf %37 : vector<16x32xf32> to vector<16x32xbf16>
    %cst_28 = arith.constant dense<0.000000e+00> : vector<16x128xf32>
    %67 = tpu.matmul %66, %12, %cst_28 {dimension_numbers = #tpu.dot_dimension_numbers<[1], [0], [0], [1], [0, 0, 1, 1], [], []>} : vector<16x32xbf16>, vector<32x128xbf16>, vector<16x128xf32> -> vector<16x128xf32>
    %68 = arith.addf %65, %67 : vector<16x128xf32>
    %69 = vector.extract_strided_slice %68 {offsets = [0, 0], sizes = [16, 96], strides = [1, 1]} : vector<16x128xf32> to vector<16x96xf32>
    %70 = arith.negf %69 : vector<16x96xf32>
    %71 = math.exp %70 : vector<16x96xf32>
    %cst_29 = arith.constant 1.000000e+00 : f32
    %72 = vector.broadcast %cst_29 : f32 to vector<16x96xf32>
    %73 = arith.addf %72, %71 : vector<16x96xf32>
    %74 = arith.divf %72, %73 : vector<16x96xf32>
    %75 = vector.extract_strided_slice %68 {offsets = [0, 96], sizes = [16, 32], strides = [1, 1]} : vector<16x128xf32> to vector<16x32xf32>
    %76 = math.tanh %75 : vector<16x32xf32>
    %77 = vector.extract_strided_slice %74 {offsets = [0, 32], sizes = [16, 32], strides = [1, 1]} : vector<16x96xf32> to vector<16x32xf32>
    %78 = arith.mulf %77, %34 : vector<16x32xf32>
    %79 = vector.extract_strided_slice %74 {offsets = [0, 0], sizes = [16, 32], strides = [1, 1]} : vector<16x96xf32> to vector<16x32xf32>
    %80 = arith.mulf %79, %76 : vector<16x32xf32>
    %81 = arith.addf %78, %80 : vector<16x32xf32>
    %82 = vector.extract_strided_slice %74 {offsets = [0, 64], sizes = [16, 32], strides = [1, 1]} : vector<16x96xf32> to vector<16x32xf32>
    %83 = math.tanh %81 : vector<16x32xf32>
    %84 = arith.mulf %82, %83 : vector<16x32xf32>
    %85 = arith.maximumf %38, %84 : vector<16x32xf32>
    %c7_i32_30 = arith.constant 7 : i32
    %86 = arith.subi %c7_i32_30, %c1_i32 : i32
    %87 = arith.index_cast %86 : i32 to index
    %c0_31 = arith.constant 0 : index
    %c0_32 = arith.constant 0 : index
    %88 = vector.load %arg14[%87, %c0_31, %c0_32] : memref<8x16x128xf32, #tpu.memory_space<vmem>>, vector<1x16x128xf32>
    %89 = vector.shape_cast %88 : vector<1x16x128xf32> to vector<16x128xf32>
    %90 = arith.truncf %61 : vector<16x32xf32> to vector<16x32xbf16>
    %cst_33 = arith.constant dense<0.000000e+00> : vector<16x128xf32>
    %91 = tpu.matmul %90, %13, %cst_33 {dimension_numbers = #tpu.dot_dimension_numbers<[1], [0], [0], [1], [0, 0, 1, 1], [], []>} : vector<16x32xbf16>, vector<32x128xbf16>, vector<16x128xf32> -> vector<16x128xf32>
    %92 = arith.addf %89, %91 : vector<16x128xf32>
    %93 = vector.extract_strided_slice %92 {offsets = [0, 0], sizes = [16, 96], strides = [1, 1]} : vector<16x128xf32> to vector<16x96xf32>
    %94 = arith.negf %93 : vector<16x96xf32>
    %95 = math.exp %94 : vector<16x96xf32>
    %cst_34 = arith.constant 1.000000e+00 : f32
    %96 = vector.broadcast %cst_34 : f32 to vector<16x96xf32>
    %97 = arith.addf %96, %95 : vector<16x96xf32>
    %98 = arith.divf %96, %97 : vector<16x96xf32>
    %99 = vector.extract_strided_slice %92 {offsets = [0, 96], sizes = [16, 32], strides = [1, 1]} : vector<16x128xf32> to vector<16x32xf32>
    %100 = math.tanh %99 : vector<16x32xf32>
    %101 = vector.extract_strided_slice %98 {offsets = [0, 32], sizes = [16, 32], strides = [1, 1]} : vector<16x96xf32> to vector<16x32xf32>
    %102 = arith.mulf %101, %58 : vector<16x32xf32>
    %103 = vector.extract_strided_slice %98 {offsets = [0, 0], sizes = [16, 32], strides = [1, 1]} : vector<16x96xf32> to vector<16x32xf32>
    %104 = arith.mulf %103, %100 : vector<16x32xf32>
    %105 = arith.addf %102, %104 : vector<16x32xf32>
    %106 = vector.extract_strided_slice %98 {offsets = [0, 64], sizes = [16, 32], strides = [1, 1]} : vector<16x96xf32> to vector<16x32xf32>
    %107 = math.tanh %105 : vector<16x32xf32>
    %108 = arith.mulf %106, %107 : vector<16x32xf32>
    %109 = arith.maximumf %62, %108 : vector<16x32xf32>
    %c2_i32 = arith.constant 2 : i32
    %110 = arith.index_cast %c2_i32 : i32 to index
    %c0_35 = arith.constant 0 : index
    %c0_36 = arith.constant 0 : index
    %111 = vector.load %arg13[%110, %c0_35, %c0_36] : memref<8x16x128xf32, #tpu.memory_space<vmem>>, vector<1x16x128xf32>
    %112 = vector.shape_cast %111 : vector<1x16x128xf32> to vector<16x128xf32>
    %113 = arith.truncf %84 : vector<16x32xf32> to vector<16x32xbf16>
    %cst_37 = arith.constant dense<0.000000e+00> : vector<16x128xf32>
    %114 = tpu.matmul %113, %12, %cst_37 {dimension_numbers = #tpu.dot_dimension_numbers<[1], [0], [0], [1], [0, 0, 1, 1], [], []>} : vector<16x32xbf16>, vector<32x128xbf16>, vector<16x128xf32> -> vector<16x128xf32>
    %115 = arith.addf %112, %114 : vector<16x128xf32>
    %116 = vector.extract_strided_slice %115 {offsets = [0, 0], sizes = [16, 96], strides = [1, 1]} : vector<16x128xf32> to vector<16x96xf32>
    %117 = arith.negf %116 : vector<16x96xf32>
    %118 = math.exp %117 : vector<16x96xf32>
    %cst_38 = arith.constant 1.000000e+00 : f32
    %119 = vector.broadcast %cst_38 : f32 to vector<16x96xf32>
    %120 = arith.addf %119, %118 : vector<16x96xf32>
    %121 = arith.divf %119, %120 : vector<16x96xf32>
    %122 = vector.extract_strided_slice %115 {offsets = [0, 96], sizes = [16, 32], strides = [1, 1]} : vector<16x128xf32> to vector<16x32xf32>
    %123 = math.tanh %122 : vector<16x32xf32>
    %124 = vector.extract_strided_slice %121 {offsets = [0, 32], sizes = [16, 32], strides = [1, 1]} : vector<16x96xf32> to vector<16x32xf32>
    %125 = arith.mulf %124, %81 : vector<16x32xf32>
    %126 = vector.extract_strided_slice %121 {offsets = [0, 0], sizes = [16, 32], strides = [1, 1]} : vector<16x96xf32> to vector<16x32xf32>
    %127 = arith.mulf %126, %123 : vector<16x32xf32>
    %128 = arith.addf %125, %127 : vector<16x32xf32>
    %129 = vector.extract_strided_slice %121 {offsets = [0, 64], sizes = [16, 32], strides = [1, 1]} : vector<16x96xf32> to vector<16x32xf32>
    %130 = math.tanh %128 : vector<16x32xf32>
    %131 = arith.mulf %129, %130 : vector<16x32xf32>
    %132 = arith.maximumf %85, %131 : vector<16x32xf32>
    %c7_i32_39 = arith.constant 7 : i32
    %133 = arith.subi %c7_i32_39, %c2_i32 : i32
    %134 = arith.index_cast %133 : i32 to index
    %c0_40 = arith.constant 0 : index
    %c0_41 = arith.constant 0 : index
    %135 = vector.load %arg14[%134, %c0_40, %c0_41] : memref<8x16x128xf32, #tpu.memory_space<vmem>>, vector<1x16x128xf32>
    %136 = vector.shape_cast %135 : vector<1x16x128xf32> to vector<16x128xf32>
    %137 = arith.truncf %108 : vector<16x32xf32> to vector<16x32xbf16>
    %cst_42 = arith.constant dense<0.000000e+00> : vector<16x128xf32>
    %138 = tpu.matmul %137, %13, %cst_42 {dimension_numbers = #tpu.dot_dimension_numbers<[1], [0], [0], [1], [0, 0, 1, 1], [], []>} : vector<16x32xbf16>, vector<32x128xbf16>, vector<16x128xf32> -> vector<16x128xf32>
    %139 = arith.addf %136, %138 : vector<16x128xf32>
    %140 = vector.extract_strided_slice %139 {offsets = [0, 0], sizes = [16, 96], strides = [1, 1]} : vector<16x128xf32> to vector<16x96xf32>
    %141 = arith.negf %140 : vector<16x96xf32>
    %142 = math.exp %141 : vector<16x96xf32>
    %cst_43 = arith.constant 1.000000e+00 : f32
    %143 = vector.broadcast %cst_43 : f32 to vector<16x96xf32>
    %144 = arith.addf %143, %142 : vector<16x96xf32>
    %145 = arith.divf %143, %144 : vector<16x96xf32>
    %146 = vector.extract_strided_slice %139 {offsets = [0, 96], sizes = [16, 32], strides = [1, 1]} : vector<16x128xf32> to vector<16x32xf32>
    %147 = math.tanh %146 : vector<16x32xf32>
    %148 = vector.extract_strided_slice %145 {offsets = [0, 32], sizes = [16, 32], strides = [1, 1]} : vector<16x96xf32> to vector<16x32xf32>
    %149 = arith.mulf %148, %105 : vector<16x32xf32>
    %150 = vector.extract_strided_slice %145 {offsets = [0, 0], sizes = [16, 32], strides = [1, 1]} : vector<16x96xf32> to vector<16x32xf32>
    %151 = arith.mulf %150, %147 : vector<16x32xf32>
    %152 = arith.addf %149, %151 : vector<16x32xf32>
    %153 = vector.extract_strided_slice %145 {offsets = [0, 64], sizes = [16, 32], strides = [1, 1]} : vector<16x96xf32> to vector<16x32xf32>
    %154 = math.tanh %152 : vector<16x32xf32>
    %155 = arith.mulf %153, %154 : vector<16x32xf32>
    %156 = arith.maximumf %109, %155 : vector<16x32xf32>
    %c3_i32 = arith.constant 3 : i32
    %157 = arith.index_cast %c3_i32 : i32 to index
    %c0_44 = arith.constant 0 : index
    %c0_45 = arith.constant 0 : index
    %158 = vector.load %arg13[%157, %c0_44, %c0_45] : memref<8x16x128xf32, #tpu.memory_space<vmem>>, vector<1x16x128xf32>
    %159 = vector.shape_cast %158 : vector<1x16x128xf32> to vector<16x128xf32>
    %160 = arith.truncf %131 : vector<16x32xf32> to vector<16x32xbf16>
    %cst_46 = arith.constant dense<0.000000e+00> : vector<16x128xf32>
    %161 = tpu.matmul %160, %12, %cst_46 {dimension_numbers = #tpu.dot_dimension_numbers<[1], [0], [0], [1], [0, 0, 1, 1], [], []>} : vector<16x32xbf16>, vector<32x128xbf16>, vector<16x128xf32> -> vector<16x128xf32>
    %162 = arith.addf %159, %161 : vector<16x128xf32>
    %163 = vector.extract_strided_slice %162 {offsets = [0, 0], sizes = [16, 96], strides = [1, 1]} : vector<16x128xf32> to vector<16x96xf32>
    %164 = arith.negf %163 : vector<16x96xf32>
    %165 = math.exp %164 : vector<16x96xf32>
    %cst_47 = arith.constant 1.000000e+00 : f32
    %166 = vector.broadcast %cst_47 : f32 to vector<16x96xf32>
    %167 = arith.addf %166, %165 : vector<16x96xf32>
    %168 = arith.divf %166, %167 : vector<16x96xf32>
    %169 = vector.extract_strided_slice %162 {offsets = [0, 96], sizes = [16, 32], strides = [1, 1]} : vector<16x128xf32> to vector<16x32xf32>
    %170 = math.tanh %169 : vector<16x32xf32>
    %171 = vector.extract_strided_slice %168 {offsets = [0, 32], sizes = [16, 32], strides = [1, 1]} : vector<16x96xf32> to vector<16x32xf32>
    %172 = arith.mulf %171, %128 : vector<16x32xf32>
    %173 = vector.extract_strided_slice %168 {offsets = [0, 0], sizes = [16, 32], strides = [1, 1]} : vector<16x96xf32> to vector<16x32xf32>
    %174 = arith.mulf %173, %170 : vector<16x32xf32>
    %175 = arith.addf %172, %174 : vector<16x32xf32>
    %176 = vector.extract_strided_slice %168 {offsets = [0, 64], sizes = [16, 32], strides = [1, 1]} : vector<16x96xf32> to vector<16x32xf32>
    %177 = math.tanh %175 : vector<16x32xf32>
    %178 = arith.mulf %176, %177 : vector<16x32xf32>
    %179 = arith.maximumf %132, %178 : vector<16x32xf32>
    %c7_i32_48 = arith.constant 7 : i32
    %180 = arith.subi %c7_i32_48, %c3_i32 : i32
    %181 = arith.index_cast %180 : i32 to index
    %c0_49 = arith.constant 0 : index
    %c0_50 = arith.constant 0 : index
    %182 = vector.load %arg14[%181, %c0_49, %c0_50] : memref<8x16x128xf32, #tpu.memory_space<vmem>>, vector<1x16x128xf32>
    %183 = vector.shape_cast %182 : vector<1x16x128xf32> to vector<16x128xf32>
    %184 = arith.truncf %155 : vector<16x32xf32> to vector<16x32xbf16>
    %cst_51 = arith.constant dense<0.000000e+00> : vector<16x128xf32>
    %185 = tpu.matmul %184, %13, %cst_51 {dimension_numbers = #tpu.dot_dimension_numbers<[1], [0], [0], [1], [0, 0, 1, 1], [], []>} : vector<16x32xbf16>, vector<32x128xbf16>, vector<16x128xf32> -> vector<16x128xf32>
    %186 = arith.addf %183, %185 : vector<16x128xf32>
    %187 = vector.extract_strided_slice %186 {offsets = [0, 0], sizes = [16, 96], strides = [1, 1]} : vector<16x128xf32> to vector<16x96xf32>
    %188 = arith.negf %187 : vector<16x96xf32>
    %189 = math.exp %188 : vector<16x96xf32>
    %cst_52 = arith.constant 1.000000e+00 : f32
    %190 = vector.broadcast %cst_52 : f32 to vector<16x96xf32>
    %191 = arith.addf %190, %189 : vector<16x96xf32>
    %192 = arith.divf %190, %191 : vector<16x96xf32>
    %193 = vector.extract_strided_slice %186 {offsets = [0, 96], sizes = [16, 32], strides = [1, 1]} : vector<16x128xf32> to vector<16x32xf32>
    %194 = math.tanh %193 : vector<16x32xf32>
    %195 = vector.extract_strided_slice %192 {offsets = [0, 32], sizes = [16, 32], strides = [1, 1]} : vector<16x96xf32> to vector<16x32xf32>
    %196 = arith.mulf %195, %152 : vector<16x32xf32>
    %197 = vector.extract_strided_slice %192 {offsets = [0, 0], sizes = [16, 32], strides = [1, 1]} : vector<16x96xf32> to vector<16x32xf32>
    %198 = arith.mulf %197, %194 : vector<16x32xf32>
    %199 = arith.addf %196, %198 : vector<16x32xf32>
    %200 = vector.extract_strided_slice %192 {offsets = [0, 64], sizes = [16, 32], strides = [1, 1]} : vector<16x96xf32> to vector<16x32xf32>
    %201 = math.tanh %199 : vector<16x32xf32>
    %202 = arith.mulf %200, %201 : vector<16x32xf32>
    %203 = arith.maximumf %156, %202 : vector<16x32xf32>
    %c4_i32 = arith.constant 4 : i32
    %204 = arith.index_cast %c4_i32 : i32 to index
    %c0_53 = arith.constant 0 : index
    %c0_54 = arith.constant 0 : index
    %205 = vector.load %arg13[%204, %c0_53, %c0_54] : memref<8x16x128xf32, #tpu.memory_space<vmem>>, vector<1x16x128xf32>
    %206 = vector.shape_cast %205 : vector<1x16x128xf32> to vector<16x128xf32>
    %207 = arith.truncf %178 : vector<16x32xf32> to vector<16x32xbf16>
    %cst_55 = arith.constant dense<0.000000e+00> : vector<16x128xf32>
    %208 = tpu.matmul %207, %12, %cst_55 {dimension_numbers = #tpu.dot_dimension_numbers<[1], [0], [0], [1], [0, 0, 1, 1], [], []>} : vector<16x32xbf16>, vector<32x128xbf16>, vector<16x128xf32> -> vector<16x128xf32>
    %209 = arith.addf %206, %208 : vector<16x128xf32>
    %210 = vector.extract_strided_slice %209 {offsets = [0, 0], sizes = [16, 96], strides = [1, 1]} : vector<16x128xf32> to vector<16x96xf32>
    %211 = arith.negf %210 : vector<16x96xf32>
    %212 = math.exp %211 : vector<16x96xf32>
    %cst_56 = arith.constant 1.000000e+00 : f32
    %213 = vector.broadcast %cst_56 : f32 to vector<16x96xf32>
    %214 = arith.addf %213, %212 : vector<16x96xf32>
    %215 = arith.divf %213, %214 : vector<16x96xf32>
    %216 = vector.extract_strided_slice %209 {offsets = [0, 96], sizes = [16, 32], strides = [1, 1]} : vector<16x128xf32> to vector<16x32xf32>
    %217 = math.tanh %216 : vector<16x32xf32>
    %218 = vector.extract_strided_slice %215 {offsets = [0, 32], sizes = [16, 32], strides = [1, 1]} : vector<16x96xf32> to vector<16x32xf32>
    %219 = arith.mulf %218, %175 : vector<16x32xf32>
    %220 = vector.extract_strided_slice %215 {offsets = [0, 0], sizes = [16, 32], strides = [1, 1]} : vector<16x96xf32> to vector<16x32xf32>
    %221 = arith.mulf %220, %217 : vector<16x32xf32>
    %222 = arith.addf %219, %221 : vector<16x32xf32>
    %223 = vector.extract_strided_slice %215 {offsets = [0, 64], sizes = [16, 32], strides = [1, 1]} : vector<16x96xf32> to vector<16x32xf32>
    %224 = math.tanh %222 : vector<16x32xf32>
    %225 = arith.mulf %223, %224 : vector<16x32xf32>
    %226 = arith.maximumf %179, %225 : vector<16x32xf32>
    %c7_i32_57 = arith.constant 7 : i32
    %227 = arith.subi %c7_i32_57, %c4_i32 : i32
    %228 = arith.index_cast %227 : i32 to index
    %c0_58 = arith.constant 0 : index
    %c0_59 = arith.constant 0 : index
    %229 = vector.load %arg14[%228, %c0_58, %c0_59] : memref<8x16x128xf32, #tpu.memory_space<vmem>>, vector<1x16x128xf32>
    %230 = vector.shape_cast %229 : vector<1x16x128xf32> to vector<16x128xf32>
    %231 = arith.truncf %202 : vector<16x32xf32> to vector<16x32xbf16>
    %cst_60 = arith.constant dense<0.000000e+00> : vector<16x128xf32>
    %232 = tpu.matmul %231, %13, %cst_60 {dimension_numbers = #tpu.dot_dimension_numbers<[1], [0], [0], [1], [0, 0, 1, 1], [], []>} : vector<16x32xbf16>, vector<32x128xbf16>, vector<16x128xf32> -> vector<16x128xf32>
    %233 = arith.addf %230, %232 : vector<16x128xf32>
    %234 = vector.extract_strided_slice %233 {offsets = [0, 0], sizes = [16, 96], strides = [1, 1]} : vector<16x128xf32> to vector<16x96xf32>
    %235 = arith.negf %234 : vector<16x96xf32>
    %236 = math.exp %235 : vector<16x96xf32>
    %cst_61 = arith.constant 1.000000e+00 : f32
    %237 = vector.broadcast %cst_61 : f32 to vector<16x96xf32>
    %238 = arith.addf %237, %236 : vector<16x96xf32>
    %239 = arith.divf %237, %238 : vector<16x96xf32>
    %240 = vector.extract_strided_slice %233 {offsets = [0, 96], sizes = [16, 32], strides = [1, 1]} : vector<16x128xf32> to vector<16x32xf32>
    %241 = math.tanh %240 : vector<16x32xf32>
    %242 = vector.extract_strided_slice %239 {offsets = [0, 32], sizes = [16, 32], strides = [1, 1]} : vector<16x96xf32> to vector<16x32xf32>
    %243 = arith.mulf %242, %199 : vector<16x32xf32>
    %244 = vector.extract_strided_slice %239 {offsets = [0, 0], sizes = [16, 32], strides = [1, 1]} : vector<16x96xf32> to vector<16x32xf32>
    %245 = arith.mulf %244, %241 : vector<16x32xf32>
    %246 = arith.addf %243, %245 : vector<16x32xf32>
    %247 = vector.extract_strided_slice %239 {offsets = [0, 64], sizes = [16, 32], strides = [1, 1]} : vector<16x96xf32> to vector<16x32xf32>
    %248 = math.tanh %246 : vector<16x32xf32>
    %249 = arith.mulf %247, %248 : vector<16x32xf32>
    %250 = arith.maximumf %203, %249 : vector<16x32xf32>
    %c5_i32 = arith.constant 5 : i32
    %251 = arith.index_cast %c5_i32 : i32 to index
    %c0_62 = arith.constant 0 : index
    %c0_63 = arith.constant 0 : index
    %252 = vector.load %arg13[%251, %c0_62, %c0_63] : memref<8x16x128xf32, #tpu.memory_space<vmem>>, vector<1x16x128xf32>
    %253 = vector.shape_cast %252 : vector<1x16x128xf32> to vector<16x128xf32>
    %254 = arith.truncf %225 : vector<16x32xf32> to vector<16x32xbf16>
    %cst_64 = arith.constant dense<0.000000e+00> : vector<16x128xf32>
    %255 = tpu.matmul %254, %12, %cst_64 {dimension_numbers = #tpu.dot_dimension_numbers<[1], [0], [0], [1], [0, 0, 1, 1], [], []>} : vector<16x32xbf16>, vector<32x128xbf16>, vector<16x128xf32> -> vector<16x128xf32>
    %256 = arith.addf %253, %255 : vector<16x128xf32>
    %257 = vector.extract_strided_slice %256 {offsets = [0, 0], sizes = [16, 96], strides = [1, 1]} : vector<16x128xf32> to vector<16x96xf32>
    %258 = arith.negf %257 : vector<16x96xf32>
    %259 = math.exp %258 : vector<16x96xf32>
    %cst_65 = arith.constant 1.000000e+00 : f32
    %260 = vector.broadcast %cst_65 : f32 to vector<16x96xf32>
    %261 = arith.addf %260, %259 : vector<16x96xf32>
    %262 = arith.divf %260, %261 : vector<16x96xf32>
    %263 = vector.extract_strided_slice %256 {offsets = [0, 96], sizes = [16, 32], strides = [1, 1]} : vector<16x128xf32> to vector<16x32xf32>
    %264 = math.tanh %263 : vector<16x32xf32>
    %265 = vector.extract_strided_slice %262 {offsets = [0, 32], sizes = [16, 32], strides = [1, 1]} : vector<16x96xf32> to vector<16x32xf32>
    %266 = arith.mulf %265, %222 : vector<16x32xf32>
    %267 = vector.extract_strided_slice %262 {offsets = [0, 0], sizes = [16, 32], strides = [1, 1]} : vector<16x96xf32> to vector<16x32xf32>
    %268 = arith.mulf %267, %264 : vector<16x32xf32>
    %269 = arith.addf %266, %268 : vector<16x32xf32>
    %270 = vector.extract_strided_slice %262 {offsets = [0, 64], sizes = [16, 32], strides = [1, 1]} : vector<16x96xf32> to vector<16x32xf32>
    %271 = math.tanh %269 : vector<16x32xf32>
    %272 = arith.mulf %270, %271 : vector<16x32xf32>
    %273 = arith.maximumf %226, %272 : vector<16x32xf32>
    %c7_i32_66 = arith.constant 7 : i32
    %274 = arith.subi %c7_i32_66, %c5_i32 : i32
    %275 = arith.index_cast %274 : i32 to index
    %c0_67 = arith.constant 0 : index
    %c0_68 = arith.constant 0 : index
    %276 = vector.load %arg14[%275, %c0_67, %c0_68] : memref<8x16x128xf32, #tpu.memory_space<vmem>>, vector<1x16x128xf32>
    %277 = vector.shape_cast %276 : vector<1x16x128xf32> to vector<16x128xf32>
    %278 = arith.truncf %249 : vector<16x32xf32> to vector<16x32xbf16>
    %cst_69 = arith.constant dense<0.000000e+00> : vector<16x128xf32>
    %279 = tpu.matmul %278, %13, %cst_69 {dimension_numbers = #tpu.dot_dimension_numbers<[1], [0], [0], [1], [0, 0, 1, 1], [], []>} : vector<16x32xbf16>, vector<32x128xbf16>, vector<16x128xf32> -> vector<16x128xf32>
    %280 = arith.addf %277, %279 : vector<16x128xf32>
    %281 = vector.extract_strided_slice %280 {offsets = [0, 0], sizes = [16, 96], strides = [1, 1]} : vector<16x128xf32> to vector<16x96xf32>
    %282 = arith.negf %281 : vector<16x96xf32>
    %283 = math.exp %282 : vector<16x96xf32>
    %cst_70 = arith.constant 1.000000e+00 : f32
    %284 = vector.broadcast %cst_70 : f32 to vector<16x96xf32>
    %285 = arith.addf %284, %283 : vector<16x96xf32>
    %286 = arith.divf %284, %285 : vector<16x96xf32>
    %287 = vector.extract_strided_slice %280 {offsets = [0, 96], sizes = [16, 32], strides = [1, 1]} : vector<16x128xf32> to vector<16x32xf32>
    %288 = math.tanh %287 : vector<16x32xf32>
    %289 = vector.extract_strided_slice %286 {offsets = [0, 32], sizes = [16, 32], strides = [1, 1]} : vector<16x96xf32> to vector<16x32xf32>
    %290 = arith.mulf %289, %246 : vector<16x32xf32>
    %291 = vector.extract_strided_slice %286 {offsets = [0, 0], sizes = [16, 32], strides = [1, 1]} : vector<16x96xf32> to vector<16x32xf32>
    %292 = arith.mulf %291, %288 : vector<16x32xf32>
    %293 = arith.addf %290, %292 : vector<16x32xf32>
    %294 = vector.extract_strided_slice %286 {offsets = [0, 64], sizes = [16, 32], strides = [1, 1]} : vector<16x96xf32> to vector<16x32xf32>
    %295 = math.tanh %293 : vector<16x32xf32>
    %296 = arith.mulf %294, %295 : vector<16x32xf32>
    %297 = arith.maximumf %250, %296 : vector<16x32xf32>
    %c6_i32 = arith.constant 6 : i32
    %298 = arith.index_cast %c6_i32 : i32 to index
    %c0_71 = arith.constant 0 : index
    %c0_72 = arith.constant 0 : index
    %299 = vector.load %arg13[%298, %c0_71, %c0_72] : memref<8x16x128xf32, #tpu.memory_space<vmem>>, vector<1x16x128xf32>
    %300 = vector.shape_cast %299 : vector<1x16x128xf32> to vector<16x128xf32>
    %301 = arith.truncf %272 : vector<16x32xf32> to vector<16x32xbf16>
    %cst_73 = arith.constant dense<0.000000e+00> : vector<16x128xf32>
    %302 = tpu.matmul %301, %12, %cst_73 {dimension_numbers = #tpu.dot_dimension_numbers<[1], [0], [0], [1], [0, 0, 1, 1], [], []>} : vector<16x32xbf16>, vector<32x128xbf16>, vector<16x128xf32> -> vector<16x128xf32>
    %303 = arith.addf %300, %302 : vector<16x128xf32>
    %304 = vector.extract_strided_slice %303 {offsets = [0, 0], sizes = [16, 96], strides = [1, 1]} : vector<16x128xf32> to vector<16x96xf32>
    %305 = arith.negf %304 : vector<16x96xf32>
    %306 = math.exp %305 : vector<16x96xf32>
    %cst_74 = arith.constant 1.000000e+00 : f32
    %307 = vector.broadcast %cst_74 : f32 to vector<16x96xf32>
    %308 = arith.addf %307, %306 : vector<16x96xf32>
    %309 = arith.divf %307, %308 : vector<16x96xf32>
    %310 = vector.extract_strided_slice %303 {offsets = [0, 96], sizes = [16, 32], strides = [1, 1]} : vector<16x128xf32> to vector<16x32xf32>
    %311 = math.tanh %310 : vector<16x32xf32>
    %312 = vector.extract_strided_slice %309 {offsets = [0, 32], sizes = [16, 32], strides = [1, 1]} : vector<16x96xf32> to vector<16x32xf32>
    %313 = arith.mulf %312, %269 : vector<16x32xf32>
    %314 = vector.extract_strided_slice %309 {offsets = [0, 0], sizes = [16, 32], strides = [1, 1]} : vector<16x96xf32> to vector<16x32xf32>
    %315 = arith.mulf %314, %311 : vector<16x32xf32>
    %316 = arith.addf %313, %315 : vector<16x32xf32>
    %317 = vector.extract_strided_slice %309 {offsets = [0, 64], sizes = [16, 32], strides = [1, 1]} : vector<16x96xf32> to vector<16x32xf32>
    %318 = math.tanh %316 : vector<16x32xf32>
    %319 = arith.mulf %317, %318 : vector<16x32xf32>
    %320 = arith.maximumf %273, %319 : vector<16x32xf32>
    %c7_i32_75 = arith.constant 7 : i32
    %321 = arith.subi %c7_i32_75, %c6_i32 : i32
    %322 = arith.index_cast %321 : i32 to index
    %c0_76 = arith.constant 0 : index
    %c0_77 = arith.constant 0 : index
    %323 = vector.load %arg14[%322, %c0_76, %c0_77] : memref<8x16x128xf32, #tpu.memory_space<vmem>>, vector<1x16x128xf32>
    %324 = vector.shape_cast %323 : vector<1x16x128xf32> to vector<16x128xf32>
    %325 = arith.truncf %296 : vector<16x32xf32> to vector<16x32xbf16>
    %cst_78 = arith.constant dense<0.000000e+00> : vector<16x128xf32>
    %326 = tpu.matmul %325, %13, %cst_78 {dimension_numbers = #tpu.dot_dimension_numbers<[1], [0], [0], [1], [0, 0, 1, 1], [], []>} : vector<16x32xbf16>, vector<32x128xbf16>, vector<16x128xf32> -> vector<16x128xf32>
    %327 = arith.addf %324, %326 : vector<16x128xf32>
    %328 = vector.extract_strided_slice %327 {offsets = [0, 0], sizes = [16, 96], strides = [1, 1]} : vector<16x128xf32> to vector<16x96xf32>
    %329 = arith.negf %328 : vector<16x96xf32>
    %330 = math.exp %329 : vector<16x96xf32>
    %cst_79 = arith.constant 1.000000e+00 : f32
    %331 = vector.broadcast %cst_79 : f32 to vector<16x96xf32>
    %332 = arith.addf %331, %330 : vector<16x96xf32>
    %333 = arith.divf %331, %332 : vector<16x96xf32>
    %334 = vector.extract_strided_slice %327 {offsets = [0, 96], sizes = [16, 32], strides = [1, 1]} : vector<16x128xf32> to vector<16x32xf32>
    %335 = math.tanh %334 : vector<16x32xf32>
    %336 = vector.extract_strided_slice %333 {offsets = [0, 32], sizes = [16, 32], strides = [1, 1]} : vector<16x96xf32> to vector<16x32xf32>
    %337 = arith.mulf %336, %293 : vector<16x32xf32>
    %338 = vector.extract_strided_slice %333 {offsets = [0, 0], sizes = [16, 32], strides = [1, 1]} : vector<16x96xf32> to vector<16x32xf32>
    %339 = arith.mulf %338, %335 : vector<16x32xf32>
    %340 = arith.addf %337, %339 : vector<16x32xf32>
    %341 = vector.extract_strided_slice %333 {offsets = [0, 64], sizes = [16, 32], strides = [1, 1]} : vector<16x96xf32> to vector<16x32xf32>
    %342 = math.tanh %340 : vector<16x32xf32>
    %343 = arith.mulf %341, %342 : vector<16x32xf32>
    %344 = arith.maximumf %297, %343 : vector<16x32xf32>
    %c7_i32_80 = arith.constant 7 : i32
    %345 = arith.index_cast %c7_i32_80 : i32 to index
    %c0_81 = arith.constant 0 : index
    %c0_82 = arith.constant 0 : index
    %346 = vector.load %arg13[%345, %c0_81, %c0_82] : memref<8x16x128xf32, #tpu.memory_space<vmem>>, vector<1x16x128xf32>
    %347 = vector.shape_cast %346 : vector<1x16x128xf32> to vector<16x128xf32>
    %348 = arith.truncf %319 : vector<16x32xf32> to vector<16x32xbf16>
    %cst_83 = arith.constant dense<0.000000e+00> : vector<16x128xf32>
    %349 = tpu.matmul %348, %12, %cst_83 {dimension_numbers = #tpu.dot_dimension_numbers<[1], [0], [0], [1], [0, 0, 1, 1], [], []>} : vector<16x32xbf16>, vector<32x128xbf16>, vector<16x128xf32> -> vector<16x128xf32>
    %350 = arith.addf %347, %349 : vector<16x128xf32>
    %351 = vector.extract_strided_slice %350 {offsets = [0, 0], sizes = [16, 96], strides = [1, 1]} : vector<16x128xf32> to vector<16x96xf32>
    %352 = arith.negf %351 : vector<16x96xf32>
    %353 = math.exp %352 : vector<16x96xf32>
    %cst_84 = arith.constant 1.000000e+00 : f32
    %354 = vector.broadcast %cst_84 : f32 to vector<16x96xf32>
    %355 = arith.addf %354, %353 : vector<16x96xf32>
    %356 = arith.divf %354, %355 : vector<16x96xf32>
    %357 = vector.extract_strided_slice %350 {offsets = [0, 96], sizes = [16, 32], strides = [1, 1]} : vector<16x128xf32> to vector<16x32xf32>
    %358 = math.tanh %357 : vector<16x32xf32>
    %359 = vector.extract_strided_slice %356 {offsets = [0, 32], sizes = [16, 32], strides = [1, 1]} : vector<16x96xf32> to vector<16x32xf32>
    %360 = arith.mulf %359, %316 : vector<16x32xf32>
    %361 = vector.extract_strided_slice %356 {offsets = [0, 0], sizes = [16, 32], strides = [1, 1]} : vector<16x96xf32> to vector<16x32xf32>
    %362 = arith.mulf %361, %358 : vector<16x32xf32>
    %363 = arith.addf %360, %362 : vector<16x32xf32>
    %364 = vector.extract_strided_slice %356 {offsets = [0, 64], sizes = [16, 32], strides = [1, 1]} : vector<16x96xf32> to vector<16x32xf32>
    %365 = math.tanh %363 : vector<16x32xf32>
    %366 = arith.mulf %364, %365 : vector<16x32xf32>
    %367 = arith.maximumf %320, %366 : vector<16x32xf32>
    %c7_i32_85 = arith.constant 7 : i32
    %368 = arith.subi %c7_i32_85, %c7_i32_80 : i32
    %369 = arith.index_cast %368 : i32 to index
    %c0_86 = arith.constant 0 : index
    %c0_87 = arith.constant 0 : index
    %370 = vector.load %arg14[%369, %c0_86, %c0_87] : memref<8x16x128xf32, #tpu.memory_space<vmem>>, vector<1x16x128xf32>
    %371 = vector.shape_cast %370 : vector<1x16x128xf32> to vector<16x128xf32>
    %372 = arith.truncf %343 : vector<16x32xf32> to vector<16x32xbf16>
    %cst_88 = arith.constant dense<0.000000e+00> : vector<16x128xf32>
    %373 = tpu.matmul %372, %13, %cst_88 {dimension_numbers = #tpu.dot_dimension_numbers<[1], [0], [0], [1], [0, 0, 1, 1], [], []>} : vector<16x32xbf16>, vector<32x128xbf16>, vector<16x128xf32> -> vector<16x128xf32>
    %374 = arith.addf %371, %373 : vector<16x128xf32>
    %375 = vector.extract_strided_slice %374 {offsets = [0, 0], sizes = [16, 96], strides = [1, 1]} : vector<16x128xf32> to vector<16x96xf32>
    %376 = arith.negf %375 : vector<16x96xf32>
    %377 = math.exp %376 : vector<16x96xf32>
    %cst_89 = arith.constant 1.000000e+00 : f32
    %378 = vector.broadcast %cst_89 : f32 to vector<16x96xf32>
    %379 = arith.addf %378, %377 : vector<16x96xf32>
    %380 = arith.divf %378, %379 : vector<16x96xf32>
    %381 = vector.extract_strided_slice %374 {offsets = [0, 96], sizes = [16, 32], strides = [1, 1]} : vector<16x128xf32> to vector<16x32xf32>
    %382 = math.tanh %381 : vector<16x32xf32>
    %383 = vector.extract_strided_slice %380 {offsets = [0, 32], sizes = [16, 32], strides = [1, 1]} : vector<16x96xf32> to vector<16x32xf32>
    %384 = arith.mulf %383, %340 : vector<16x32xf32>
    %385 = vector.extract_strided_slice %380 {offsets = [0, 0], sizes = [16, 32], strides = [1, 1]} : vector<16x96xf32> to vector<16x32xf32>
    %386 = arith.mulf %385, %382 : vector<16x32xf32>
    %387 = arith.addf %384, %386 : vector<16x32xf32>
    %388 = vector.extract_strided_slice %380 {offsets = [0, 64], sizes = [16, 32], strides = [1, 1]} : vector<16x96xf32> to vector<16x32xf32>
    %389 = math.tanh %387 : vector<16x32xf32>
    %390 = arith.mulf %388, %389 : vector<16x32xf32>
    %391 = arith.maximumf %344, %390 : vector<16x32xf32>
    %c8_i32 = arith.constant 8 : i32
    %392 = tpu.concatenate %367, %391 in 1 : vector<16x32xf32>, vector<16x32xf32> -> vector<16x64xf32>
    %393 = vector.extract_strided_slice %392 {offsets = [0, 0], sizes = [8, 64], strides = [1, 1]} : vector<16x64xf32> to vector<8x64xf32>
    %394 = vector.extract_strided_slice %392 {offsets = [8, 0], sizes = [8, 64], strides = [1, 1]} : vector<16x64xf32> to vector<8x64xf32>
    %395 = arith.subf %393, %394 : vector<8x64xf32>
    %396 = arith.mulf %393, %394 : vector<8x64xf32>
    %c0_90 = arith.constant 0 : index
    %c0_91 = arith.constant 0 : index
    %397 = vector.load %arg6[%c0_90, %c0_91] : memref<256x32xbf16, #tpu.memory_space<vmem>>, vector<256x32xbf16>
    %398 = vector.extract_strided_slice %397 {offsets = [0, 0], sizes = [64, 32], strides = [1, 1]} : vector<256x32xbf16> to vector<64x32xbf16>
    %399 = arith.truncf %393 : vector<8x64xf32> to vector<8x64xbf16>
    %cst_92 = arith.constant dense<0.000000e+00> : vector<8x32xf32>
    %400 = tpu.matmul %399, %398, %cst_92 {dimension_numbers = #tpu.dot_dimension_numbers<[1], [0], [0], [1], [0, 0, 1, 1], [], []>} : vector<8x64xbf16>, vector<64x32xbf16>, vector<8x32xf32> -> vector<8x32xf32>
    %401 = vector.extract_strided_slice %397 {offsets = [64, 0], sizes = [64, 32], strides = [1, 1]} : vector<256x32xbf16> to vector<64x32xbf16>
    %402 = arith.truncf %394 : vector<8x64xf32> to vector<8x64xbf16>
    %cst_93 = arith.constant dense<0.000000e+00> : vector<8x32xf32>
    %403 = tpu.matmul %402, %401, %cst_93 {dimension_numbers = #tpu.dot_dimension_numbers<[1], [0], [0], [1], [0, 0, 1, 1], [], []>} : vector<8x64xbf16>, vector<64x32xbf16>, vector<8x32xf32> -> vector<8x32xf32>
    %404 = arith.addf %400, %403 : vector<8x32xf32>
    %405 = vector.extract_strided_slice %397 {offsets = [128, 0], sizes = [64, 32], strides = [1, 1]} : vector<256x32xbf16> to vector<64x32xbf16>
    %406 = arith.truncf %395 : vector<8x64xf32> to vector<8x64xbf16>
    %cst_94 = arith.constant dense<0.000000e+00> : vector<8x32xf32>
    %407 = tpu.matmul %406, %405, %cst_94 {dimension_numbers = #tpu.dot_dimension_numbers<[1], [0], [0], [1], [0, 0, 1, 1], [], []>} : vector<8x64xbf16>, vector<64x32xbf16>, vector<8x32xf32> -> vector<8x32xf32>
    %408 = arith.addf %404, %407 : vector<8x32xf32>
    %409 = vector.extract_strided_slice %397 {offsets = [192, 0], sizes = [64, 32], strides = [1, 1]} : vector<256x32xbf16> to vector<64x32xbf16>
    %410 = arith.truncf %396 : vector<8x64xf32> to vector<8x64xbf16>
    %cst_95 = arith.constant dense<0.000000e+00> : vector<8x32xf32>
    %411 = tpu.matmul %410, %409, %cst_95 {dimension_numbers = #tpu.dot_dimension_numbers<[1], [0], [0], [1], [0, 0, 1, 1], [], []>} : vector<8x64xbf16>, vector<64x32xbf16>, vector<8x32xf32> -> vector<8x32xf32>
    %412 = arith.addf %408, %411 : vector<8x32xf32>
    %c0_96 = arith.constant 0 : index
    %c0_97 = arith.constant 0 : index
    %413 = vector.load %arg7[%c0_96, %c0_97] : memref<1x32xf32, #tpu.memory_space<vmem>>, vector<1x32xf32>
    %414 = vector.broadcast %413 : vector<1x32xf32> to vector<8x32xf32>
    %415 = arith.addf %412, %414 : vector<8x32xf32>
    %cst_98 = arith.constant 0.000000e+00 : f32
    %416 = vector.broadcast %cst_98 : f32 to vector<8x32xf32>
    %417 = arith.maximumf %415, %416 : vector<8x32xf32>
    %c0_99 = arith.constant 0 : index
    %c0_100 = arith.constant 0 : index
    %418 = vector.load %arg8[%c0_99, %c0_100] : memref<288x32xbf16, #tpu.memory_space<vmem>>, vector<288x32xbf16>
    %419 = vector.extract_strided_slice %418 {offsets = [0, 0], sizes = [64, 32], strides = [1, 1]} : vector<288x32xbf16> to vector<64x32xbf16>
    %420 = arith.truncf %393 : vector<8x64xf32> to vector<8x64xbf16>
    %cst_101 = arith.constant dense<0.000000e+00> : vector<8x32xf32>
    %421 = tpu.matmul %420, %419, %cst_101 {dimension_numbers = #tpu.dot_dimension_numbers<[1], [0], [0], [1], [0, 0, 1, 1], [], []>} : vector<8x64xbf16>, vector<64x32xbf16>, vector<8x32xf32> -> vector<8x32xf32>
    %422 = vector.extract_strided_slice %418 {offsets = [64, 0], sizes = [64, 32], strides = [1, 1]} : vector<288x32xbf16> to vector<64x32xbf16>
    %423 = arith.truncf %394 : vector<8x64xf32> to vector<8x64xbf16>
    %cst_102 = arith.constant dense<0.000000e+00> : vector<8x32xf32>
    %424 = tpu.matmul %423, %422, %cst_102 {dimension_numbers = #tpu.dot_dimension_numbers<[1], [0], [0], [1], [0, 0, 1, 1], [], []>} : vector<8x64xbf16>, vector<64x32xbf16>, vector<8x32xf32> -> vector<8x32xf32>
    %425 = arith.addf %421, %424 : vector<8x32xf32>
    %426 = vector.extract_strided_slice %418 {offsets = [128, 0], sizes = [64, 32], strides = [1, 1]} : vector<288x32xbf16> to vector<64x32xbf16>
    %427 = arith.truncf %395 : vector<8x64xf32> to vector<8x64xbf16>
    %cst_103 = arith.constant dense<0.000000e+00> : vector<8x32xf32>
    %428 = tpu.matmul %427, %426, %cst_103 {dimension_numbers = #tpu.dot_dimension_numbers<[1], [0], [0], [1], [0, 0, 1, 1], [], []>} : vector<8x64xbf16>, vector<64x32xbf16>, vector<8x32xf32> -> vector<8x32xf32>
    %429 = arith.addf %425, %428 : vector<8x32xf32>
    %430 = vector.extract_strided_slice %418 {offsets = [192, 0], sizes = [64, 32], strides = [1, 1]} : vector<288x32xbf16> to vector<64x32xbf16>
    %431 = arith.truncf %396 : vector<8x64xf32> to vector<8x64xbf16>
    %cst_104 = arith.constant dense<0.000000e+00> : vector<8x32xf32>
    %432 = tpu.matmul %431, %430, %cst_104 {dimension_numbers = #tpu.dot_dimension_numbers<[1], [0], [0], [1], [0, 0, 1, 1], [], []>} : vector<8x64xbf16>, vector<64x32xbf16>, vector<8x32xf32> -> vector<8x32xf32>
    %433 = arith.addf %429, %432 : vector<8x32xf32>
    %434 = vector.extract_strided_slice %418 {offsets = [256, 0], sizes = [32, 32], strides = [1, 1]} : vector<288x32xbf16> to vector<32x32xbf16>
    %435 = arith.truncf %417 : vector<8x32xf32> to vector<8x32xbf16>
    %cst_105 = arith.constant dense<0.000000e+00> : vector<8x32xf32>
    %436 = tpu.matmul %435, %434, %cst_105 {dimension_numbers = #tpu.dot_dimension_numbers<[1], [0], [0], [1], [0, 0, 1, 1], [], []>} : vector<8x32xbf16>, vector<32x32xbf16>, vector<8x32xf32> -> vector<8x32xf32>
    %437 = arith.addf %433, %436 : vector<8x32xf32>
    %c0_106 = arith.constant 0 : index
    %c0_107 = arith.constant 0 : index
    %438 = vector.load %arg9[%c0_106, %c0_107] : memref<1x32xf32, #tpu.memory_space<vmem>>, vector<1x32xf32>
    %439 = vector.broadcast %438 : vector<1x32xf32> to vector<8x32xf32>
    %440 = arith.addf %437, %439 : vector<8x32xf32>
    %cst_108 = arith.constant 0.000000e+00 : f32
    %441 = vector.broadcast %cst_108 : f32 to vector<8x32xf32>
    %442 = arith.maximumf %440, %441 : vector<8x32xf32>
    %c0_109 = arith.constant 0 : index
    %c0_110 = arith.constant 0 : index
    %443 = vector.load %arg10[%c0_109, %c0_110] : memref<32x128xbf16, #tpu.memory_space<vmem>>, vector<32x128xbf16>
    %444 = arith.truncf %442 : vector<8x32xf32> to vector<8x32xbf16>
    %cst_111 = arith.constant dense<0.000000e+00> : vector<8x128xf32>
    %445 = tpu.matmul %444, %443, %cst_111 {dimension_numbers = #tpu.dot_dimension_numbers<[1], [0], [0], [1], [0, 0, 1, 1], [], []>} : vector<8x32xbf16>, vector<32x128xbf16>, vector<8x128xf32> -> vector<8x128xf32>
    %c0_112 = arith.constant 0 : index
    %c0_113 = arith.constant 0 : index
    %446 = vector.load %arg11[%c0_112, %c0_113] : memref<1x128xf32, #tpu.memory_space<vmem>>, vector<1x128xf32>
    %447 = vector.broadcast %446 : vector<1x128xf32> to vector<8x128xf32>
    %448 = arith.addf %445, %447 : vector<8x128xf32>
    %c0_114 = arith.constant 0 : index
    %c0_115 = arith.constant 0 : index
    %449 = vector.load %arg12[%c0_114, %c0_115] : memref<8x128xf32, #tpu.memory_space<vmem>>, vector<8x128xf32>
    tpu.vector_store %arg12[%c0_114, %c0_115], %448 {strides = array<i32>} : memref<8x128xf32, #tpu.memory_space<vmem>>, vector<8x128xf32>,
    return
  }
  func.func @transform_0(%arg0: i32) -> (i32, i32, i32) {
    %c0_i32 = arith.constant 0 : i32
    %c0_i32_0 = arith.constant 0 : i32
    %c0_i32_1 = arith.constant 0 : i32
    return %c0_i32, %arg0, %c0_i32_0 : i32, i32, i32
  }
  func.func @transform_1(%arg0: i32) -> (i32, i32) {
    %c0_i32 = arith.constant 0 : i32
    %c0_i32_0 = arith.constant 0 : i32
    %c0_i32_1 = arith.constant 0 : i32
    return %c0_i32, %c0_i32_0 : i32, i32
  }
  func.func @transform_2(%arg0: i32) -> (i32, i32) {
    %c0_i32 = arith.constant 0 : i32
    %c0_i32_0 = arith.constant 0 : i32
    %c0_i32_1 = arith.constant 0 : i32
    return %c0_i32, %c0_i32_0 : i32, i32
  }
  func.func @transform_3(%arg0: i32) -> (i32, i32) {
    %c0_i32 = arith.constant 0 : i32
    %c0_i32_0 = arith.constant 0 : i32
    %c0_i32_1 = arith.constant 0 : i32
    return %c0_i32, %c0_i32_0 : i32, i32
  }
  func.func @transform_4(%arg0: i32) -> (i32, i32) {
    %c0_i32 = arith.constant 0 : i32
    %c0_i32_0 = arith.constant 0 : i32
    %c0_i32_1 = arith.constant 0 : i32
    return %c0_i32, %c0_i32_0 : i32, i32
  }
  func.func @transform_5(%arg0: i32) -> (i32, i32) {
    %c0_i32 = arith.constant 0 : i32
    %c0_i32_0 = arith.constant 0 : i32
    %c0_i32_1 = arith.constant 0 : i32
    return %c0_i32, %c0_i32_0 : i32, i32
  }
  func.func @transform_6(%arg0: i32) -> (i32, i32) {
    %c0_i32 = arith.constant 0 : i32
    %c0_i32_0 = arith.constant 0 : i32
    %c0_i32_1 = arith.constant 0 : i32
    return %c0_i32, %c0_i32_0 : i32, i32
  }
  func.func @transform_7(%arg0: i32) -> (i32, i32) {
    %c0_i32 = arith.constant 0 : i32
    %c0_i32_0 = arith.constant 0 : i32
    %c0_i32_1 = arith.constant 0 : i32
    return %c0_i32, %c0_i32_0 : i32, i32
  }
  func.func @transform_8(%arg0: i32) -> (i32, i32) {
    %c0_i32 = arith.constant 0 : i32
    %c0_i32_0 = arith.constant 0 : i32
    %c0_i32_1 = arith.constant 0 : i32
    return %c0_i32, %c0_i32_0 : i32, i32
  }
  func.func @transform_9(%arg0: i32) -> (i32, i32) {
    %c0_i32 = arith.constant 0 : i32
    %c0_i32_0 = arith.constant 0 : i32
    %c0_i32_1 = arith.constant 0 : i32
    return %c0_i32, %c0_i32_0 : i32, i32
  }
  func.func @transform_10(%arg0: i32) -> (i32, i32) {
    %c0_i32 = arith.constant 0 : i32
    %c0_i32_0 = arith.constant 0 : i32
    %c0_i32_1 = arith.constant 0 : i32
    return %c0_i32, %c0_i32_0 : i32, i32
  }
  func.func @transform_11(%arg0: i32) -> (i32, i32) {
    %c0_i32 = arith.constant 0 : i32
    %c0_i32_0 = arith.constant 0 : i32
    return %arg0, %c0_i32 : i32, i32
  }
}

</mosaic_0001>

<bundles_post_ra>
// kernel: bilstm_maxpooling_forward.1
= control target key start
LH: loop header
LB: loop body
LE: loop exit
PB: predicated region body
PF: predicated region fallthrough
CT: control target
= control target key end

     0   :  { %s4137_s17 = smov 0   ;;  %s4139_s18 = smov 0   ;;  %s5054_s0 = inlined_call_operand.vmem [shape: bf16[8,32,32], index: 0, kind: input, shape index: {}]   ;;  %s5055_s1 = inlined_call_operand.vmem [shape: bf16[32,256], index: 1, kind: input, shape index: {}]   ;;  %s5056_s2 = inlined_call_operand.vmem [shape: f32[1,256], index: 2, kind: input, shape index: {}]   ;;  %s5057_s3 = inlined_call_operand.vmem [shape: bf16[32,128], index: 3, kind: input, shape index: {}]   ;;  %s5058_s4 = inlined_call_operand.vmem [shape: bf16[32,128], index: 4, kind: input, shape index: {}]   ;;  %s5059_s5 = inlined_call_operand.vmem [shape: bf16[256,32], index: 5, kind: input, shape index: {}]   ;;  %s5060_s6 = inlined_call_operand.vmem [shape: f32[1,32], index: 6, kind: input, shape index: {}]   ;;  %s5061_s7 = inlined_call_operand.vmem [shape: bf16[288,32], index: 7, kind: input, shape index: {}]   ;;  %s5062_s8 = inlined_call_operand.vmem [shape: f32[1,32], index: 8, kind: input, shape index: {}]   ;;  %s5063_s9 = inlined_call_operand.vmem [shape: bf16[32,128], index: 9, kind: input, shape index: {}]   ;;  %s5064_s10 = inlined_call_operand.vmem [shape: f32[1,128], index: 10, kind: input, shape index: {}]   ;;  %s5065_s11 = inlined_call_operand.vmem [shape: f32[16,128], index: 11, kind: output, shape index: {}]  }
   0x1   :  { %s4141_s19 = smov 0  }
   0x2 LB: > { %s3237_s20 = sadd.s32 4294967295, %s4069_s19   ;;  %s4154_s21 = sadd.s32 1, %s4069_s19   ;;  %s4069_s19 = sphi %s4141_s19, %s5068_s19   ;;  %s4065_s18 = sphi %s4139_s18, %s5067_s18   ;;  %s4061_s17 = sphi %s4137_s17, %s5066_s17  }
   0x3   : > { %s25_s22 = ssub.s32 %s4069_s19, %s4154_s21  ;;  %s28_s23 = sadd.s32 1, %s4065_s18 }
   0x4   : > { %p26_p0 = scmp.eq.s32.totalorder %s25_s22, 0  ;;  %p35_p1 = scmp.ne.s32.totalorder %s4065_s18, %s4061_s17 }
   0x5   : > { %p36_p2 = scmp.eq.s32.totalorder %s4069_s19, 0  ;;  %p3240_p4 = scmp.ge.s32.totalorder %s4069_s19, 2 }
   0x6   : > { %s4163_s24 = scalar_select %p26_p0, %s4065_s18, %s28_s23  }
   0x7   : > { %p37_p3 = por %p36_p2, %p35_p1  ;;  %327 = sbr.rel (%p3240_p4) target bundleno = 22 (0x16), region = 56 }
   0xe   : > { %330 = sbr.rel (!%p37_p3) target bundleno = 22 (0x16), region = 60  ;;  %s332_s25 = sand.u32 (%p37_p3), 1, %s4065_s18  }
   0xf   : > { %s3368_s26 = sshll.u32 (%p37_p3), %s4069_s19, 3  ;;  %s3241_s27 = sshll.u32 (%p37_p3), %s332_s25, 6 }
  0x10   : > { %s337_s30 = scalar_lea.vmem (%p37_p3), %s5054_s0, %s3368_s26  ;;  %s334_s12 = scalar_lea.vmem (%p37_p3), [#allocation4], %s3241_s27 }
  0x11   : > { %v353_v0 = vld [vmem:[%s337_s30] sm:$0xff] (%p37_p3)   ;;  %v357_v1 = vld [vmem:[%s337_s30 + $0x10] sm:$0xff] (%p37_p3)  }
  0x12   : > { %v361_v2 = vld [vmem:[%s337_s30 + $0x20] sm:$0xff] (%p37_p3)   ;;  %354 = vst [vmem:[%s334_s12] sm:$0xff] (%p37_p3), %v353_v0   ;;  %358 = vst [vmem:[%s334_s12 + $0x8] sm:$0xff] (%p37_p3), %v357_v1   ;;  %v365_v3 = vld [vmem:[%s337_s30 + $0x30] sm:$0xff] (%p37_p3)  }
  0x13   : > { %362 = vst [vmem:[%s334_s12 + $0x10] sm:$0xff] (%p37_p3), %v361_v2   ;;  %v369_v4 = vld [vmem:[%s337_s30 + $0x40] sm:$0xff] (%p37_p3)   ;;  %v373_v5 = vld [vmem:[%s337_s30 + $0x50] sm:$0xff] (%p37_p3)   ;;  %366 = vst [vmem:[%s334_s12 + $0x18] sm:$0xff] (%p37_p3), %v365_v3  }
  0x14   : > { %370 = vst [vmem:[%s334_s12 + $0x20] sm:$0xff] (%p37_p3), %v369_v4   ;;  %374 = vst [vmem:[%s334_s12 + $0x28] sm:$0xff] (%p37_p3), %v373_v5   ;;  %v377_v6 = vld [vmem:[%s337_s30 + $0x60] sm:$0xff] (%p37_p3)   ;;  %v381_v7 = vld [vmem:[%s337_s30 + $0x70] sm:$0xff] (%p37_p3)  }
  0x15   : > { %378 = vst [vmem:[%s334_s12 + $0x30] sm:$0xff] %v377_v6   ;;  %382 = vst [vmem:[%s334_s12 + $0x38] sm:$0xff] %v381_v7  }
  0x16 PF: > { %p3244_p5 = scmp.ge.s32.totalorder %s4069_s19, 1  ;;  %p438_p6 = scmp.lt.s32.totalorder %s4069_s19, 3 }
  0x18   : > { %p439_p7 = pnand %p3244_p5, %p438_p6 }
  0x19   : > { %v3733_v8 = vld [vmem:[%s5055_s1 + $0x4] ss:$8 sps:$4 sm:$0xff] (!%p439_p7)   ;;  %v3735_v9 = vld [vmem:[%s5055_s1] ss:$8 sps:$4 sm:$0xff] (!%p439_p7)   ;;  %v4071_v10 = vmov (!%p439_p7), 0.0   ;;  %v4072_v11 = vmov (!%p439_p7), 0   ;;  %v511_v26 = vlaneseq (!%p439_p7) }
  0x1a   : > { %442 = sbr.rel (%p439_p7) target bundleno = 6422 (0x1916), region = 101  ;;  %3463 = vmatprep.subr.bf16.mxu1 (!%p439_p7), %v4071_v10  ;;  %638 = vmatprep.mubr.bf16.mxu0 (!%p439_p7), %v4072_v11  ;;  %v4183_v12 = vld [vmem:[%s5057_s3] sm:$0xff] (!%p439_p7)   ;;  %s445_s25 = sand.u32 (!%p439_p7), 1, %s4061_s17   ;;  %v3737_v13 = vld [vmem:[%s5055_s1 + $0x14] ss:$8 sps:$4 sm:$0xff] (!%p439_p7)   ;;  %vm4073_vm0 = vmmov (!%p439_p7), 0  }
  0x1b   : > { %606 = vmatprep.subr.bf16.mxu0 (!%p439_p7), %v3733_v8  ;;  %v3739_v14 = vld [vmem:[%s5055_s1 + $0x10] ss:$8 sps:$4 sm:$0xff] (!%p439_p7)   ;;  %3467 = vmatprep.mubr.msk.bf16.mxu1 (!%p439_p7), %vm4073_vm0, %v4071_v10  ;;  %v4198_v15 = vld [vmem:[%s5057_s3 + $0x8] sm:$0xff] (!%p439_p7)   ;;  %s3245_s17 = sshll.u32 (!%p439_p7), %s445_s25, 6  ;;  %vm581_vm1 = vcmask (!%p439_p7), 261120   ;;  %v4208_v17 = vld [vmem:[%s5058_s4] sm:$0xff] (!%p439_p7)  }
  0x1c   : > { %607 = vmatpush1.bf16.msra.mxu0 (!%p439_p7), %v3735_v9  ;;  %3464 = vmatpush3.bf16.msra.mxu1 (!%p439_p7), %v4183_v12  ;;  %s4201_s13 = scalar_lea.vmem (!%p439_p7), [#allocation4], %s3245_s17  ;;  %v4220_v18 = vld [vmem:[%s5058_s4 + $0x8] sm:$0xff] (!%p439_p7)   ;;  %v512_v27 = vshrl.u32 (!%p439_p7), %v511_v26, 7  ;;  %v509_v29 = vld [vmem:[%s5056_s2] sm:$0x3] (!%p439_p7)  ;;  %s4074_s26 = smov (!%p439_p7), 32  }
  0x1d   : > { %608 = vmatprep.subr.bf16.mxu0 (!%p439_p7), %v3737_v13  ;;  %3465 = vmatprep.subr.bf16.mxu1 (!%p439_p7), %v4071_v10  ;;  %v3741_v16 = vld [vmem:[%s4201_s13] sm:$0xff] (!%p439_p7)   ;;  %v3742_v19 = vld [vmem:[%s4201_s13 + $0x8] sm:$0xff] (!%p439_p7)   ;;  %v3743_v20 = vld [vmem:[%s4201_s13 + $0x10] sm:$0xff] (!%p439_p7)   ;;  %s4075_s27 = smov (!%p439_p7), 64   ;;  %s4076_s25 = smov (!%p439_p7), 96   ;;  %vm2492_vm2 = vcmask (!%p439_p7), 523264  }
  0x1e   : > { %v3744_v21 = vld [vmem:[%s4201_s13 + $0x18] sm:$0xff] (!%p439_p7)   ;;  %v3745_v22 = vld [vmem:[%s4201_s13 + $0x20] sm:$0xff] (!%p439_p7)   ;;  %v3746_v23 = vld [vmem:[%s4201_s13 + $0x28] sm:$0xff] (!%p439_p7)   ;;  %v513_v28 = vsub.s32 (!%p439_p7), 0, %v512_v27  ;;  %v517_v30 = vsub.s32 (!%p439_p7), 1, %v512_v27  ;;  %p484_p8 = scmp.lt.s32.totalorder (!%p439_p7), %s3237_s20, 1 }
  0x1f   : > { %v3747_v24 = vld [vmem:[%s4201_s13 + $0x30] sm:$0xff] (!%p439_p7)   ;;  %v3750_v25 = vld [vmem:[%s4201_s13 + $0x38] sm:$0xff] (!%p439_p7)  }
  0x20   : > { %609 = vmatpush1.bf16.msra.mxu0 (!%p439_p7), %v3739_v14  ;;  %3466 = vmatpush3.bf16.msra.mxu1 (!%p439_p7), %v4198_v15  ;;  %v4253_v31 = vrot.slane (!%p439_p7), %v509_v29, %v513_v28  ;;  %v4255_v32 = vrot.slane (!%p439_p7), %v509_v29, %v517_v30 }
  0x21   : > { %3527 = vmatprep.subr.bf16.mxu0 %v4071_v10  ;;  %3471 = vmatprep.subr.bf16.mxu1 %v4071_v10  ;;  %s5070_s20 = smov (!%p484_p8, %s3237_s20), 1 }
  0x22   : > { %s3246_s12 = sshll.u32 %s5070_s20, 3 }
  0x23   : > { %3259 = vmatmul.mubr.msk.bf16.vlgmr.msra.gmra.mrb[0].mxu0 %vm581_vm1, %v3741_v16  ;;  %3468 = vmatmul.mubr.bf16.vlgmr.msra.gmra.mrb[0].mxu1 %v4072_v11  ;;  %s487_s15 = scalar_lea.vmem %s5065_s11, %s3246_s12 }
  0x24   : > { %648 = vmatprep.mubr.bf16.mxu0 %v4072_v11  ;;  %3472 = vmatpush3.bf16.msra.mxu1 %v4208_v17 }
  0x25   : > { %3475 = vmatprep.mubr.msk.bf16.mxu1 %vm4073_vm0, %v4071_v10  ;;  %3473 = vmatprep.subr.bf16.mxu1 %v4071_v10 }
  0x26   : > { %3528 = vmatpush3.bf16.msra.mxu0 %v4183_v12 }
  0x27   : > { %3529 = vmatprep.subr.bf16.mxu0 %v4071_v10 }
  0x28   : > { %3474 = vmatpush3.bf16.msra.mxu1 %v4220_v18 }
  0x29   : > { %3479 = vmatprep.subr.bf16.mxu1 %v4071_v10 }
  0x2a   : > { %3530 = vmatpush3.bf16.msra.mxu0 %v4198_v15 }
  0x2b   : > { %3260 = vmatmul.mubr.msk.bf16.gmra.mrb[4].mxu0 %vm581_vm1, %v3742_v19  ;;  %3543 = vmatprep.subr.bf16.mxu0 %v4071_v10 }
  0x2c   : > { %658 = vmatprep.mubr.bf16.mxu0 %v4072_v11  ;;  %3476 = vmatmul.mubr.bf16.vlgmr.msra.gmra.mrb[4].mxu1 %v4072_v11 }
  0x2d   : > { %3480 = vmatpush3.bf16.msra.mxu1 %v4183_v12  ;;  %3483 = vmatprep.mubr.msk.bf16.mxu1 %vm4073_vm0, %v4071_v10 }
  0x2e   : > { %3481 = vmatprep.subr.bf16.mxu1 %v4071_v10 }
  0x31   : > { %3482 = vmatpush3.bf16.msra.mxu1 %v4198_v15 }
  0x32   : > { %3487 = vmatprep.subr.bf16.mxu1 %v4071_v10 }
  0x33   : > { %3261 = vmatmul.mubr.msk.bf16.gmra.mrb[8].mxu0 %vm581_vm1, %v3743_v20 }
  0x34   : > { %668 = vmatprep.mubr.bf16.mxu0 %v4072_v11 }
  0x3b   : > { %3262 = vmatmul.mubr.msk.bf16.gmra.mrb[12].mxu0 %vm581_vm1, %v3744_v21 }
  0x3c   : > { %678 = vmatprep.mubr.bf16.mxu0 %v4072_v11 }
  0x43   : > { %3263 = vmatmul.mubr.msk.bf16.gmra.mrb[16].mxu0 %vm581_vm1, %v3745_v22 }
  0x44   : > { %688 = vmatprep.mubr.bf16.mxu0 %v4072_v11 }
  0x4b   : > { %3264 = vmatmul.mubr.msk.bf16.gmra.mrb[20].mxu0 %vm581_vm1, %v3746_v23 }
  0x4c   : > { %698 = vmatprep.mubr.bf16.mxu0 %v4072_v11 }
  0x53   : > { %3265 = vmatmul.mubr.msk.bf16.gmra.mrb[24].mxu0 %vm581_vm1, %v3747_v24 }
  0x54   : > { %708 = vmatprep.mubr.bf16.mxu0 %v4072_v11 }
  0x5b   : > { %3266 = vmatmul.mubr.msk.bf16.gmra.mrb[28].mxu0 %vm581_vm1, %v3750_v25 }
  0x5c   : > { %3531 = vmatprep.mubr.msk.bf16.mxu0 %vm4073_vm0, %v4071_v10 }
  0xf6   : > { %v640_v33 = vpop.f32.mrb[0].mxu0  ;;  %v810_v36 = vpop.f32.mrb[0].mxu1 }
  0xf7   : > { %v641_v34 = vadd.f32 %v640_v33, %v4253_v31  ;;  %v642_v35 = vpop.f32.mrb[1].mxu0  ;;  %v3469_v39 = vpop.f32.mrb[1].mxu1 }
  0xf8   : > { %v4259_v37 = vadd.f32 %v642_v35, %v4255_v32  ;;  %v644_v38 = vpop.f32.mrb[2].mxu0  ;;  %v813_v43 = vpop.f32.mrb[2].mxu1 }
  0xf9   : > { %v645_v40 = vadd.f32 %v644_v38, %v4253_v31  ;;  %v4262_v41 = vadd.f32 %v810_v36, %v641_v34  ;;  %v646_v42 = vpop.f32.mrb[3].mxu0  ;;  %v3470_v45 = vpop.f32.mrb[3].mxu1 }
  0xfa   : > { %v4265_v44 = vadd.f32 %v646_v42, %v4255_v32 }
  0xfb   : > { %3787 = vtanh.f32 %v4262_v41  ;;  %v4268_v46 = vadd.f32 %v813_v43, %v645_v40 }
  0xfd   : > { %3789 = vtanh.f32 %v4268_v46 }
  0xfe   : > { %v650_v47 = vpop.f32.mrb[4].mxu0 }
  0xff   : > { %v4272_v48 = vadd.f32 %v650_v47, %v4253_v31  ;;  %v652_v49 = vpop.f32.mrb[5].mxu0  ;;  %v916_v50 = vpop.f32.mrb[4].mxu1 }
 0x100   : > { %v4275_v51 = vadd.f32 %v652_v49, %v4255_v32  ;;  %v654_v52 = vpop.f32.mrb[6].mxu0  ;;  %v3477_v53 = vpop.f32.mrb[5].mxu1 }
 0x101   : > { %v4278_v54 = vadd.f32 %v654_v52, %v4253_v31  ;;  %v656_v55 = vpop.f32.mrb[7].mxu0  ;;  %v919_v56 = vpop.f32.mrb[6].mxu1 }
 0x102   : > { %v4281_v57 = vadd.f32 %v656_v55, %v4255_v32  ;;  %v3478_v58 = vpop.f32.mrb[7].mxu1 }
 0x105   : > { %v3788_v59 = vpop.eup %3787 }
 0x106   : > { %v660_v60 = vpop.f32.mrb[8].mxu0  ;;  %837 = vrot.lane.b32.xlu0 %v3788_v59, %s4074_s26 }
 0x107   : > { %v4285_v61 = vadd.f32 %v660_v60, %v4253_v31  ;;  %v662_v62 = vpop.f32.mrb[9].mxu0  ;;  %v3790_v1 = vpop.eup %3789 }
 0x108   : > { %v4288_v63 = vadd.f32 %v662_v62, %v4255_v32  ;;  %v664_v0 = vpop.f32.mrb[10].mxu0 }
 0x109   : > { %v4291_v2 = vadd.f32 %v664_v0, %v4253_v31  ;;  %v666_v3 = vpop.f32.mrb[11].mxu0 }
 0x10a   : > { %v4294_v4 = vadd.f32 %v666_v3, %v4255_v32  ;;  %839 = vrot.lane.b32.xlu0 %v3790_v1, %s4074_s26 }
 0x10e   : > { %v670_v5 = vpop.f32.mrb[12].mxu0 }
 0x10f   : > { %v4298_v6 = vadd.f32 %v670_v5, %v4253_v31  ;;  %v672_v7 = vpop.f32.mrb[13].mxu0 }
 0x110   : > { %v4301_v8 = vadd.f32 %v672_v7, %v4255_v32  ;;  %v674_v9 = vpop.f32.mrb[14].mxu0  ;;  %v3269_v7 = vmul.f32 -1.442695, %v4262_v41 }
 0x111   : > { %v4304_v11 = vadd.f32 %v674_v9, %v4253_v31  ;;  %v676_v13 = vpop.f32.mrb[15].mxu0  ;;  %v3270_v9 = vmul.f32 -1.442695, %v4268_v46 }
 0x112   : > { %v4307_v14 = vadd.f32 %v676_v13, %v4255_v32 }
 0x116   : > { %v680_v16 = vpop.f32.mrb[16].mxu0 }
 0x117   : > { %v4310_v19 = vadd.f32 %v680_v16, %v4253_v31  ;;  %v682_v20 = vpop.f32.mrb[17].mxu0 }
 0x118   : > { %v4313_v21 = vadd.f32 %v682_v20, %v4255_v32  ;;  %v684_v22 = vpop.f32.mrb[18].mxu0 }
 0x119   : > { %v4316_v23 = vadd.f32 %v684_v22, %v4253_v31  ;;  %v686_v24 = vpop.f32.mrb[19].mxu0 }
 0x11a   : > { %v4319_v25 = vadd.f32 %v686_v24, %v4255_v32 }
 0x11e   : > { %v690_v26 = vpop.f32.mrb[20].mxu0 }
 0x11f   : > { %v4322_v27 = vadd.f32 %v690_v26, %v4253_v31  ;;  %v692_v28 = vpop.f32.mrb[21].mxu0 }
 0x120   : > { %v4325_v29 = vadd.f32 %v692_v28, %v4255_v32  ;;  %v694_v30 = vpop.f32.mrb[22].mxu0 }
 0x121   : > { %v4328_v33 = vadd.f32 %v694_v30, %v4253_v31  ;;  %v696_v34 = vpop.f32.mrb[23].mxu0 }
 0x122   : > { %v4331_v35 = vadd.f32 %v696_v34, %v4255_v32 }
 0x126   : > { %v700_v36 = vpop.f32.mrb[24].mxu0 }
 0x127   : > { %v4334_v38 = vadd.f32 %v700_v36, %v4253_v31  ;;  %v702_v39 = vpop.f32.mrb[25].mxu0 }
 0x128   : > { %v4337_v40 = vadd.f32 %v702_v39, %v4255_v32  ;;  %v704_v42 = vpop.f32.mrb[26].mxu0 }
 0x129   : > { %v4340_v43 = vadd.f32 %v704_v42, %v4253_v31  ;;  %v706_v45 = vpop.f32.mrb[27].mxu0 }
 0x12a   : > { %v4343_v47 = vadd.f32 %v706_v45, %v4255_v32 }
 0x12e   : > { %v710_v49 = vpop.f32.mrb[28].mxu0 }
 0x12f   : > { %v4346_v52 = vadd.f32 %v710_v49, %v4253_v31  ;;  %v712_v53 = vpop.f32.mrb[29].mxu0 }
 0x130   : > { %v713_v55 = vadd.f32 %v712_v53, %v4255_v32  ;;  %v714_v58 = vpop.f32.mrb[30].mxu0 }
 0x131   : > { %v4350_v59 = vadd.f32 %v714_v58, %v4253_v31  ;;  %v716_v60 = vpop.f32.mrb[31].mxu0 }
 0x132   : > { %v923_v62 = vadd.f32 %v916_v50, %v713_v55  ;;  %v717_v0 = vadd.f32 %v716_v60, %v4255_v32 }
 0x134   : > { %3791 = vtanh.f32 %v923_v62  ;;  %v924_v1 = vadd.f32 %v919_v56, %v717_v0  ;;  %v3273_v41 = vmul.f32 -1.442695, %v923_v62 }
 0x136   : > { %3793 = vtanh.f32 %v924_v1  ;;  %v3274_v46 = vmul.f32 -1.442695, %v924_v1 }
 0x137   : > { %3795 = vpow2.f32 %v3269_v7 }
 0x138   : > { %3797 = vpow2.f32 %v3270_v9 }
 0x13e   : > { %v3792_v3 = vpop.eup %3791 }
 0x13f   : > { %943 = vrot.lane.b32.xlu1 %v3792_v3, %s4074_s26 }
 0x140   : > { %v3794_v5 = vpop.eup %3793 }
 0x141   : > { %v3796_v31 = vpop.eup %3795 }
 0x142   : > { %v825_v13 = vadd.f32 1.0, %v3796_v31  ;;  %v3798_v50 = vpop.eup %3797 }
 0x143   : > { %945 = vrot.lane.b32.xlu1 %v3794_v5, %s4074_s26  ;;  %v826_v32 = vadd.f32 1.0, %v3798_v50 }
 0x144   : > { %3799 = vrcp.f32 %v825_v13 }
 0x145   : > { %3801 = vrcp.f32 %v826_v32 }
 0x146   : > { %3803 = vpow2.f32 %v3273_v41 }
 0x147   : > { %3805 = vpow2.f32 %v3274_v46 }
 0x14e   : > { %v3800_v56 = vpop.eup %3799 }
 0x14f   : > { %v3802_v22 = vpop.eup %3801  ;;  %v833_v58 = vmul.f32 0.0, %v3800_v56 }
 0x150   : > { %v3804_v28 = vpop.eup %3803  ;;  %v834_v0 = vmul.f32 0.0, %v3802_v22 }
 0x151   : > { %v931_v30 = vadd.f32 1.0, %v3804_v28  ;;  %v3806_v34 = vpop.eup %3805 }
 0x152   : > { %v932_v36 = vadd.f32 1.0, %v3806_v34 }
 0x153   : > { %3807 = vrcp.f32 %v931_v30 }
 0x154   : > { %3809 = vrcp.f32 %v932_v36 }
 0x15d   : > { %v3808_v39 = vpop.eup %3807 }
 0x15e   : > { %v3810_v49 = vpop.eup %3809  ;;  %v939_v9 = vmul.f32 0.0, %v3808_v39 }
 0x15f   : > { %v940_v50 = vmul.f32 0.0, %v3810_v49 }
 0x178   : > { %v838_v16 = vpop.permute.xlu0 %837 }
 0x179   : > { %v843_v20 = vmul.f32 %v3800_v56, %v838_v16 }
 0x17b   : > { %847 = vrot.lane.b32.xlu0 %v843_v20, %s4074_s26 }
 0x17c   : > { %v840_v24 = vpop.permute.xlu0 %839 }
 0x17d   : > { %v844_v26 = vmul.f32 %v3802_v22, %v840_v24 }
 0x17f   : > { %849 = vrot.lane.b32.xlu1 %v844_v26, %s4074_s26 }
 0x1b1   : > { %v944_v42 = vpop.permute.xlu1 %943 }
 0x1b2   : > { %v949_v45 = vmul.f32 %v3808_v39, %v944_v42 }
 0x1b4   : > { %953 = vrot.lane.b32.xlu0 %v949_v45, %s4074_s26 }
 0x1b5   : > { %v946_v53 = vpop.permute.xlu1 %945 }
 0x1b6   : > { %v950_v55 = vmul.f32 %v3810_v49, %v946_v53 }
 0x1b8   : > { %955 = vrot.lane.b32.xlu1 %v950_v55, %s4074_s26 }
 0x1ed   : > { %v848_v60 = vpop.permute.xlu0 %847 }
 0x1ee   : > { %v4361_v62 = vadd.f32 %v848_v60, %v833_v58 }
 0x1f0   : > { %3811 = vtanh.f32 %v4361_v62 }
 0x1f1   : > { %v850_v1 = vpop.permute.xlu1 %849 }
 0x1f2   : > { %v4364_v3 = vadd.f32 %v850_v1, %v834_v0 }
 0x1f4   : > { %3813 = vtanh.f32 %v4364_v3 }
 0x1fa   : > { %v3812_v5 = vpop.eup %3811 }
 0x1fb   : > { %859 = vrot.lane.b32.xlu0 %v3812_v5, %s4074_s26 }
 0x1fe   : > { %v3814_v7 = vpop.eup %3813 }
 0x1ff   : > { %861 = vrot.lane.b32.xlu1 %v3814_v7, %s4074_s26 }
 0x226   : > { %v954_v31 = vpop.permute.xlu0 %953 }
 0x227   : > { %v4369_v13 = vadd.f32 %v954_v31, %v939_v9 }
 0x229   : > { %3815 = vtanh.f32 %v4369_v13 }
 0x22a   : > { %v956_v32 = vpop.permute.xlu1 %955 }
 0x22b   : > { %v4372_v16 = vadd.f32 %v956_v32, %v940_v50 }
 0x22d   : > { %3817 = vtanh.f32 %v4372_v16 }
 0x233   : > { %v3816_v20 = vpop.eup %3815 }
 0x234   : > { %965 = vrot.lane.b32.xlu0 %v3816_v20, %s4074_s26 }
 0x237   : > { %v3818_v24 = vpop.eup %3817 }
 0x238   : > { %967 = vrot.lane.b32.xlu1 %v3818_v24, %s4074_s26 }
 0x26d   : > { %v860_v26 = vpop.permute.xlu0 %859 }
 0x26e   : > { %v4377_v46 = vmul.f32 %v3800_v56, %v860_v26 }
 0x271   : > { %v862_v41 = vpop.permute.xlu1 %861 }
 0x272   : > { %v4379_v28 = vmul.f32 %v3802_v22, %v862_v41 }
 0x274   : > { %v976_v30 = vpack.c.bf16 %v4379_v28, %v4377_v46 }
 0x276   : > { %978 = vrot.lane.b32.xlu0 %v976_v30, %s4075_s27 }
 0x2a6   : > { %v966_v34 = vpop.permute.xlu0 %965 }
 0x2a7   : > { %v4384_v42 = vmul.f32 %v3808_v39, %v966_v34 }
 0x2aa   : > { %v968_v36 = vpop.permute.xlu1 %967 }
 0x2ab   : > { %v4386_v45 = vmul.f32 %v3810_v49, %v968_v36 }
 0x2ad   : > { %v1079_v53 = vpack.c.bf16 %v4386_v45, %v4384_v42 }
 0x2af   : > { %1081 = vrot.lane.b32.xlu1 %v1079_v53, %s4075_s27 }
 0x2e8   : > { %v979_v56 = vpop.permute.xlu0 %978 }
 0x2e9   : > { %3484 = vmatmul.mubr.msk.bf16.vlgmr.msra.gmra.mrb[8].mxu1 %vm581_vm1, %v979_v56 }
 0x2ea   : > { %3488 = vmatpush3.bf16.msra.mxu1 %v4208_v17  ;;  %3491 = vmatprep.mubr.msk.bf16.mxu1 %vm4073_vm0, %v4071_v10 }
 0x2eb   : > { %3489 = vmatprep.subr.bf16.mxu1 %v4071_v10 }
 0x2ee   : > { %3490 = vmatpush3.bf16.msra.mxu1 %v4220_v18 }
 0x2ef   : > { %3495 = vmatprep.subr.bf16.mxu1 %v4071_v10 }
 0x321   : > { %v1082_v22 = vpop.permute.xlu1 %1081 }
 0x322   : > { %3492 = vmatmul.mubr.msk.bf16.vlgmr.msra.gmra.mrb[12].mxu1 %vm581_vm1, %v1082_v22 }
 0x323   : > { %3496 = vmatpush3.bf16.msra.mxu1 %v4183_v12  ;;  %3499 = vmatprep.mubr.msk.bf16.mxu1 %vm4073_vm0, %v4071_v10 }
 0x324   : > { %3497 = vmatprep.subr.bf16.mxu1 %v4071_v10 }
 0x327   : > { %3498 = vmatpush3.bf16.msra.mxu1 %v4198_v15 }
 0x328   : > { %3503 = vmatprep.subr.bf16.mxu1 %v4071_v10 }
 0x3bc   : > { %v1017_v39 = vpop.f32.mrb[8].mxu1 }
 0x3bd   : > { %v1024_v49 = vadd.f32 %v1017_v39, %v4272_v48  ;;  %v3485_v55 = vpop.f32.mrb[9].mxu1 }
 0x3be   : > { %v1020_v58 = vpop.f32.mrb[10].mxu1 }
 0x3bf   : > { %3819 = vtanh.f32 %v1024_v49  ;;  %v1025_v60 = vadd.f32 %v1020_v58, %v4278_v54  ;;  %v3486_v0 = vpop.f32.mrb[11].mxu1  ;;  %v3276_v24 = vmul.f32 -1.442695, %v1024_v49 }
 0x3c1   : > { %3821 = vtanh.f32 %v1025_v60  ;;  %v3277_v26 = vmul.f32 -1.442695, %v1025_v60 }
 0x3c9   : > { %v3820_v1 = vpop.eup %3819 }
 0x3ca   : > { %1044 = vrot.lane.b32.xlu0 %v3820_v1, %s4074_s26 }
 0x3cb   : > { %v3822_v5 = vpop.eup %3821 }
 0x3cc   : > { %1046 = vrot.lane.b32.xlu1 %v3822_v5, %s4074_s26 }
 0x3f5   : > { %v1120_v7 = vpop.f32.mrb[12].mxu1 }
 0x3f6   : > { %v1127_v9 = vadd.f32 %v1120_v7, %v4337_v40  ;;  %v3493_v31 = vpop.f32.mrb[13].mxu1 }
 0x3f7   : > { %v1123_v50 = vpop.f32.mrb[14].mxu1 }
 0x3f8   : > { %3823 = vtanh.f32 %v1127_v9  ;;  %v1128_v48 = vadd.f32 %v1123_v50, %v4343_v47  ;;  %v3494_v32 = vpop.f32.mrb[15].mxu1  ;;  %v3279_v49 = vmul.f32 -1.442695, %v1127_v9 }
 0x3fa   : > { %3825 = vtanh.f32 %v1128_v48  ;;  %v3280_v55 = vmul.f32 -1.442695, %v1128_v48 }
 0x3fb   : > { %3827 = vpow2.f32 %v3276_v24 }
 0x3fc   : > { %3829 = vpow2.f32 %v3277_v26 }
 0x402   : > { %v3824_v20 = vpop.eup %3823 }
 0x403   : > { %1147 = vrot.lane.b32.xlu0 %v3824_v20, %s4074_s26 }
 0x404   : > { %v3826_v54 = vpop.eup %3825 }
 0x405   : > { %1149 = vrot.lane.b32.xlu1 %v3826_v54, %s4074_s26  ;;  %v3828_v41 = vpop.eup %3827 }
 0x406   : > { %v3830_v30 = vpop.eup %3829  ;;  %v1032_v40 = vadd.f32 1.0, %v3828_v41 }
 0x407   : > { %v1033_v34 = vadd.f32 1.0, %v3830_v30 }
 0x408   : > { %3831 = vrcp.f32 %v1032_v40 }
 0x409   : > { %3833 = vrcp.f32 %v1033_v34 }
 0x40a   : > { %3835 = vpow2.f32 %v3279_v49 }
 0x40b   : > { %3837 = vpow2.f32 %v3280_v55 }
 0x412   : > { %v3832_v36 = vpop.eup %3831 }
 0x413   : > { %v3834_v56 = vpop.eup %3833  ;;  %v1040_v9 = vmul.f32 %v3832_v36, %v4361_v62 }
 0x414   : > { %v3836_v58 = vpop.eup %3835  ;;  %v1041_v24 = vmul.f32 %v3834_v56, %v4364_v3 }
 0x415   : > { %v3838_v60 = vpop.eup %3837  ;;  %v1135_v0 = vadd.f32 1.0, %v3836_v58 }
 0x416   : > { %v1136_v1 = vadd.f32 1.0, %v3838_v60 }
 0x417   : > { %3839 = vrcp.f32 %v1135_v0 }
 0x418   : > { %3841 = vrcp.f32 %v1136_v1 }
 0x421   : > { %v3840_v5 = vpop.eup %3839 }
 0x422   : > { %v3842_v50 = vpop.eup %3841  ;;  %v1143_v62 = vmul.f32 %v3840_v5, %v4369_v13 }
 0x423   : > { %v1144_v3 = vmul.f32 %v3842_v50, %v4372_v16 }
 0x43c   : > { %v1045_v47 = vpop.permute.xlu0 %1044 }
 0x43d   : > { %v1050_v53 = vmul.f32 %v3832_v36, %v1045_v47 }
 0x43e   : > { %v1047_v22 = vpop.permute.xlu1 %1046 }
 0x43f   : > { %1054 = vrot.lane.b32.xlu0 %v1050_v53, %s4074_s26  ;;  %v1051_v39 = vmul.f32 %v3834_v56, %v1047_v22 }
 0x441   : > { %1056 = vrot.lane.b32.xlu1 %v1051_v39, %s4074_s26 }
 0x475   : > { %v1148_v7 = vpop.permute.xlu0 %1147 }
 0x476   : > { %v1153_v31 = vmul.f32 %v3840_v5, %v1148_v7 }
 0x477   : > { %v1150_v32 = vpop.permute.xlu1 %1149 }
 0x478   : > { %1157 = vrot.lane.b32.xlu0 %v1153_v31, %s4074_s26  ;;  %v1154_v20 = vmul.f32 %v3842_v50, %v1150_v32 }
 0x47a   : > { %1159 = vrot.lane.b32.xlu1 %v1154_v20, %s4074_s26 }
 0x4b1   : > { %v1055_v48 = vpop.permute.xlu0 %1054 }
 0x4b2   : > { %v4418_v54 = vadd.f32 %v1055_v48, %v1040_v9 }
 0x4b3   : > { %v1057_v26 = vpop.permute.xlu1 %1056 }
 0x4b4   : > { %3843 = vtanh.f32 %v4418_v54  ;;  %v4422_v41 = vadd.f32 %v1057_v26, %v1041_v24 }
 0x4b6   : > { %3845 = vtanh.f32 %v4422_v41 }
 0x4be   : > { %v3844_v30 = vpop.eup %3843 }
 0x4bf   : > { %1066 = vrot.lane.b32.xlu0 %v3844_v30, %s4074_s26 }
 0x4c0   : > { %v3846_v40 = vpop.eup %3845 }
 0x4c1   : > { %1068 = vrot.lane.b32.xlu1 %v3846_v40, %s4074_s26 }
 0x4ea   : > { %v1158_v34 = vpop.permute.xlu0 %1157 }
 0x4eb   : > { %v4428_v47 = vadd.f32 %v1158_v34, %v1143_v62 }
 0x4ec   : > { %v1160_v53 = vpop.permute.xlu1 %1159 }
 0x4ed   : > { %3847 = vtanh.f32 %v4428_v47  ;;  %v4432_v22 = vadd.f32 %v1160_v53, %v1144_v3 }
 0x4ef   : > { %3849 = vtanh.f32 %v4432_v22 }
 0x4f7   : > { %v3848_v39 = vpop.eup %3847 }
 0x4f8   : > { %1169 = vrot.lane.b32.xlu0 %v3848_v39, %s4074_s26 }
 0x4f9   : > { %v3850_v49 = vpop.eup %3849 }
 0x4fa   : > { %1171 = vrot.lane.b32.xlu1 %v3850_v49, %s4074_s26 }
 0x531   : > { %v1067_v55 = vpop.permute.xlu0 %1066 }
 0x532   : > { %v4437_v58 = vmul.f32 %v3832_v36, %v1067_v55 }
 0x533   : > { %v1069_v13 = vpop.permute.xlu1 %1068 }
 0x534   : > { %v4439_v60 = vmul.f32 %v3834_v56, %v1069_v13 }
 0x536   : > { %v1182_v16 = vpack.c.bf16 %v4439_v60, %v4437_v58 }
 0x538   : > { %1184 = vrot.lane.b32.xlu0 %v1182_v16, %s4075_s27 }
 0x56a   : > { %v1170_v0 = vpop.permute.xlu0 %1169 }
 0x56b   : > { %v4444_v7 = vmul.f32 %v3840_v5, %v1170_v0 }
 0x56c   : > { %v1172_v1 = vpop.permute.xlu1 %1171 }
 0x56d   : > { %v4446_v31 = vmul.f32 %v3842_v50, %v1172_v1 }
 0x56f   : > { %v1285_v32 = vpack.c.bf16 %v4446_v31, %v4444_v7 }
 0x571   : > { %1287 = vrot.lane.b32.xlu1 %v1285_v32, %s4075_s27 }
 0x5aa   : > { %v1185_v36 = vpop.permute.xlu0 %1184 }
 0x5ab   : > { %3500 = vmatmul.mubr.msk.bf16.vlgmr.msra.gmra.mrb[16].mxu1 %vm581_vm1, %v1185_v36 }
 0x5ac   : > { %3504 = vmatpush3.bf16.msra.mxu1 %v4208_v17  ;;  %3507 = vmatprep.mubr.msk.bf16.mxu1 %vm4073_vm0, %v4071_v10 }
 0x5ad   : > { %3505 = vmatprep.subr.bf16.mxu1 %v4071_v10 }
 0x5b0   : > { %3506 = vmatpush3.bf16.msra.mxu1 %v4220_v18 }
 0x5b1   : > { %3511 = vmatprep.subr.bf16.mxu1 %v4071_v10 }
 0x5e3   : > { %v1288_v56 = vpop.permute.xlu1 %1287 }
 0x5e4   : > { %3508 = vmatmul.mubr.msk.bf16.vlgmr.msra.gmra.mrb[20].mxu1 %vm581_vm1, %v1288_v56 }
 0x5e5   : > { %3512 = vmatpush3.bf16.msra.mxu1 %v4183_v12  ;;  %3515 = vmatprep.mubr.msk.bf16.mxu1 %vm4073_vm0, %v4071_v10 }
 0x5e6   : > { %3513 = vmatprep.subr.bf16.mxu1 %v4071_v10 }
 0x5e9   : > { %3514 = vmatpush3.bf16.msra.mxu1 %v4198_v15 }
 0x5ea   : > { %3519 = vmatprep.subr.bf16.mxu1 %v4071_v10 }
 0x67e   : > { %v1223_v17 = vpop.f32.mrb[16].mxu1 }
 0x67f   : > { %v1230_v5 = vadd.f32 %v1223_v17, %v4285_v61  ;;  %v3501_v50 = vpop.f32.mrb[17].mxu1 }
 0x680   : > { %v1226_v20 = vpop.f32.mrb[18].mxu1 }
 0x681   : > { %3851 = vtanh.f32 %v1230_v5  ;;  %v1231_v9 = vadd.f32 %v1226_v20, %v4291_v2  ;;  %v3502_v48 = vpop.f32.mrb[19].mxu1  ;;  %v3282_v3 = vmul.f32 -1.442695, %v1230_v5 }
 0x683   : > { %3853 = vtanh.f32 %v1231_v9  ;;  %v3283_v53 = vmul.f32 -1.442695, %v1231_v9 }
 0x68b   : > { %v3852_v12 = vpop.eup %3851 }
 0x68c   : > { %1250 = vrot.lane.b32.xlu0 %v3852_v12, %s4074_s26 }
 0x68d   : > { %v3854_v24 = vpop.eup %3853 }
 0x68e   : > { %1252 = vrot.lane.b32.xlu1 %v3854_v24, %s4074_s26 }
 0x6b7   : > { %v1326_v26 = vpop.f32.mrb[20].mxu1 }
 0x6b8   : > { %v1333_v15 = vadd.f32 %v1326_v26, %v4325_v29  ;;  %v3509_v30 = vpop.f32.mrb[21].mxu1 }
 0x6b9   : > { %v1329_v40 = vpop.f32.mrb[22].mxu1 }
 0x6ba   : > { %3855 = vtanh.f32 %v1333_v15  ;;  %v1334_v61 = vadd.f32 %v1329_v40, %v4331_v35  ;;  %v3510_v62 = vpop.f32.mrb[23].mxu1  ;;  %v3285_v36 = vmul.f32 -1.442695, %v1333_v15 }
 0x6bc   : > { %3857 = vtanh.f32 %v1334_v61  ;;  %v3286_v56 = vmul.f32 -1.442695, %v1334_v61 }
 0x6bd   : > { %3859 = vpow2.f32 %v3282_v3 }
 0x6be   : > { %3861 = vpow2.f32 %v3283_v53 }
 0x6c4   : > { %v3856_v34 = vpop.eup %3855 }
 0x6c5   : > { %1353 = vrot.lane.b32.xlu0 %v3856_v34, %s4074_s26 }
 0x6c6   : > { %v3858_v2 = vpop.eup %3857 }
 0x6c7   : > { %1355 = vrot.lane.b32.xlu1 %v3858_v2, %s4074_s26  ;;  %v3860_v39 = vpop.eup %3859 }
 0x6c8   : > { %v3862_v49 = vpop.eup %3861  ;;  %v1238_v29 = vadd.f32 1.0, %v3860_v39 }
 0x6c9   : > { %v1239_v55 = vadd.f32 1.0, %v3862_v49 }
 0x6ca   : > { %3863 = vrcp.f32 %v1238_v29 }
 0x6cb   : > { %3865 = vrcp.f32 %v1239_v55 }
 0x6cc   : > { %3867 = vpow2.f32 %v3285_v36 }
 0x6cd   : > { %3869 = vpow2.f32 %v3286_v56  ;;  %v1075_v56 = vmax.f32 %v4379_v28, %v4439_v60 }
 0x6d4   : > { %v3864_v13 = vpop.eup %3863 }
 0x6d5   : > { %v3866_v0 = vpop.eup %3865  ;;  %v1246_v15 = vmul.f32 %v3864_v13, %v4418_v54 }
 0x6d6   : > { %v3868_v17 = vpop.eup %3867  ;;  %v1247_v62 = vmul.f32 %v3866_v0, %v4422_v41 }
 0x6d7   : > { %v3870_v5 = vpop.eup %3869  ;;  %v1341_v50 = vadd.f32 1.0, %v3868_v17 }
 0x6d8   : > { %v1342_v20 = vadd.f32 1.0, %v3870_v5 }
 0x6d9   : > { %3871 = vrcp.f32 %v1341_v50 }
 0x6da   : > { %3873 = vrcp.f32 %v1342_v20 }
 0x6e3   : > { %v3872_v9 = vpop.eup %3871 }
 0x6e4   : > { %v3874_v24 = vpop.eup %3873  ;;  %v1349_v54 = vmul.f32 %v3872_v9, %v4428_v47  ;;  %v1074_v47 = vmax.f32 %v4377_v46, %v4437_v58  ;;  %v1178_v58 = vmax.f32 %v4386_v45, %v4446_v31 }
 0x6e5   : > { %v1350_v41 = vmul.f32 %v3874_v24, %v4432_v22 }
 0x6fe   : > { %v1251_v35 = vpop.permute.xlu0 %1250 }
 0x6ff   : > { %v1256_v16 = vmul.f32 %v3864_v13, %v1251_v35 }
 0x700   : > { %v1253_v1 = vpop.permute.xlu1 %1252 }
 0x701   : > { %1260 = vrot.lane.b32.xlu0 %v1256_v16, %s4074_s26  ;;  %v1257_v32 = vmul.f32 %v3866_v0, %v1253_v1 }
 0x703   : > { %1262 = vrot.lane.b32.xlu1 %v1257_v32, %s4074_s26 }
 0x737   : > { %v1354_v48 = vpop.permute.xlu0 %1353 }
 0x738   : > { %v1359_v12 = vmul.f32 %v3872_v9, %v1354_v48  ;;  %v1177_v48 = vmax.f32 %v4384_v42, %v4444_v7  ;;  %v4519_v42 = vld [vmem:[%s5058_s4] sm:$0xff]   ;;  %v4535_v7 = vld [vmem:[%s5058_s4 + $0x8] sm:$0xff]  }
 0x739   : > { %v1356_v26 = vpop.permute.xlu1 %1355 }
 0x73a   : > { %1363 = vrot.lane.b32.xlu0 %v1359_v12, %s4074_s26  ;;  %v1360_v30 = vmul.f32 %v3874_v24, %v1356_v26 }
 0x73c   : > { %1365 = vrot.lane.b32.xlu1 %v1360_v30, %s4074_s26 }
 0x773   : > { %v1261_v40 = vpop.permute.xlu0 %1260 }
 0x774   : > { %v4478_v61 = vadd.f32 %v1261_v40, %v1246_v15 }
 0x775   : > { %v1263_v34 = vpop.permute.xlu1 %1262 }
 0x776   : > { %3875 = vtanh.f32 %v4478_v61  ;;  %v4482_v2 = vadd.f32 %v1263_v34, %v1247_v62 }
 0x778   : > { %3877 = vtanh.f32 %v4482_v2 }
 0x780   : > { %v3876_v3 = vpop.eup %3875 }
 0x781   : > { %1272 = vrot.lane.b32.xlu0 %v3876_v3, %s4074_s26 }
 0x782   : > { %v3878_v53 = vpop.eup %3877 }
 0x783   : > { %1274 = vrot.lane.b32.xlu1 %v3878_v53, %s4074_s26 }
 0x7ac   : > { %v1364_v39 = vpop.permute.xlu0 %1363 }
 0x7ad   : > { %v4488_v49 = vadd.f32 %v1364_v39, %v1349_v54 }
 0x7ae   : > { %v1366_v29 = vpop.permute.xlu1 %1365 }
 0x7af   : > { %3879 = vtanh.f32 %v4488_v49  ;;  %v4492_v55 = vadd.f32 %v1366_v29, %v1350_v41 }
 0x7b1   : > { %3881 = vtanh.f32 %v4492_v55 }
 0x7b9   : > { %v3880_v35 = vpop.eup %3879 }
 0x7ba   : > { %1375 = vrot.lane.b32.xlu0 %v3880_v35, %s4074_s26 }
 0x7bb   : > { %v3882_v16 = vpop.eup %3881 }
 0x7bc   : > { %1377 = vrot.lane.b32.xlu1 %v3882_v16, %s4074_s26 }
 0x7f3   : > { %v1273_v1 = vpop.permute.xlu0 %1272 }
 0x7f4   : > { %v1278_v32 = vmul.f32 %v3864_v13, %v1273_v1 }
 0x7f5   : > { %v1275_v22 = vpop.permute.xlu1 %1274 }
 0x7f6   : > { %v4499_v36 = vmax.f32 %v1074_v47, %v1278_v32  ;;  %v1279_v17 = vmul.f32 %v3866_v0, %v1275_v22 }
 0x7f8   : > { %v4503_v5 = vmax.f32 %v1075_v56, %v1279_v17  ;;  %v1388_v50 = vpack.c.bf16 %v1279_v17, %v1278_v32 }
 0x7fa   : > { %1390 = vrot.lane.b32.xlu0 %v1388_v50, %s4075_s27 }
 0x82c   : > { %v1376_v20 = vpop.permute.xlu0 %1375 }
 0x82d   : > { %v1381_v12 = vmul.f32 %v3872_v9, %v1376_v20 }
 0x82e   : > { %v1378_v46 = vpop.permute.xlu1 %1377 }
 0x82f   : > { %v4508_v26 = vmax.f32 %v1177_v48, %v1381_v12  ;;  %v1382_v13 = vmul.f32 %v3874_v24, %v1378_v46 }
 0x831   : > { %v4512_v30 = vmax.f32 %v1178_v58, %v1382_v13  ;;  %v1491_v28 = vpack.c.bf16 %v1382_v13, %v1381_v12 }
 0x833   : > { %1493 = vrot.lane.b32.xlu1 %v1491_v28, %s4075_s27 }
 0x86c   : > { %v1391_v60 = vpop.permute.xlu0 %1390 }
 0x86d   : > { %3516 = vmatmul.mubr.msk.bf16.vlgmr.msra.gmra.mrb[24].mxu1 %vm581_vm1, %v1391_v60 }
 0x86e   : > { %3520 = vmatpush3.bf16.msra.mxu1 %v4519_v42  ;;  %3523 = vmatprep.mubr.msk.bf16.mxu1 %vm4073_vm0, %v4071_v10 }
 0x86f   : > { %3521 = vmatprep.subr.bf16.mxu1 %v4071_v10 }
 0x872   : > { %3522 = vmatpush3.bf16.msra.mxu1 %v4220_v18 }
 0x873   : > { %3535 = vmatprep.subr.bf16.mxu1 %v4071_v10 }
 0x8a5   : > { %v1494_v45 = vpop.permute.xlu1 %1493 }
 0x8a6   : > { %3524 = vmatmul.mubr.msk.bf16.vlgmr.msra.gmra.mrb[28].mxu1 %vm581_vm1, %v1494_v45 }
 0x8a7   : > { %3536 = vmatpush3.bf16.msra.mxu1 %v4519_v42  ;;  %3539 = vmatprep.mubr.msk.bf16.mxu1 %vm4073_vm0, %v4071_v10 }
 0x8a8   : > { %3537 = vmatprep.subr.bf16.mxu1 %v4071_v10 }
 0x8ab   : > { %3538 = vmatpush3.bf16.msra.mxu1 %v4535_v7 }
 0x8ac   : > { %3551 = vmatprep.subr.bf16.mxu1 %v4071_v10 }
 0x940   : > { %v1429_v18 = vpop.f32.mrb[24].mxu1 }
 0x941   : > { %v1436_v31 = vadd.f32 %v1429_v18, %v4298_v6  ;;  %v3517_v0 = vpop.f32.mrb[25].mxu1 }
 0x942   : > { %v1432_v9 = vpop.f32.mrb[26].mxu1 }
 0x943   : > { %3883 = vtanh.f32 %v1436_v31  ;;  %v1437_v24 = vadd.f32 %v1432_v9, %v4304_v11  ;;  %v3518_v15 = vpop.f32.mrb[27].mxu1  ;;  %v3288_v29 = vmul.f32 -1.442695, %v1436_v31 }
 0x945   : > { %3885 = vtanh.f32 %v1437_v24  ;;  %v3289_v35 = vmul.f32 -1.442695, %v1437_v24 }
 0x94d   : > { %v3884_v40 = vpop.eup %3883 }
 0x94e   : > { %1456 = vrot.lane.b32.xlu0 %v3884_v40, %s4074_s26 }
 0x94f   : > { %v3886_v62 = vpop.eup %3885 }
 0x950   : > { %1458 = vrot.lane.b32.xlu1 %v3886_v62, %s4074_s26 }
 0x979   : > { %v1532_v34 = vpop.f32.mrb[28].mxu1 }
 0x97a   : > { %v1539_v3 = vadd.f32 %v1532_v34, %v4313_v21  ;;  %v3525_v53 = vpop.f32.mrb[29].mxu1 }
 0x97b   : > { %v1535_v54 = vpop.f32.mrb[30].mxu1 }
 0x97c   : > { %3887 = vtanh.f32 %v1539_v3  ;;  %v1540_v6 = vadd.f32 %v1535_v54, %v4319_v25  ;;  %v3526_v39 = vpop.f32.mrb[31].mxu1  ;;  %v3291_v20 = vmul.f32 -1.442695, %v1539_v3 }
 0x97e   : > { %3889 = vtanh.f32 %v1540_v6  ;;  %v3292_v48 = vmul.f32 -1.442695, %v1540_v6 }
 0x97f   : > { %3891 = vpow2.f32 %v3288_v29 }
 0x980   : > { %3893 = vpow2.f32 %v3289_v35 }
 0x986   : > { %v3888_v41 = vpop.eup %3887 }
 0x987   : > { %1559 = vrot.lane.b32.xlu0 %v3888_v41, %s4074_s26 }
 0x988   : > { %v3890_v11 = vpop.eup %3889 }
 0x989   : > { %1561 = vrot.lane.b32.xlu1 %v3890_v11, %s4074_s26  ;;  %v3892_v16 = vpop.eup %3891 }
 0x98a   : > { %v3894_v1 = vpop.eup %3893  ;;  %v1444_v21 = vadd.f32 1.0, %v3892_v16 }
 0x98b   : > { %v1445_v47 = vadd.f32 1.0, %v3894_v1 }
 0x98c   : > { %3895 = vrcp.f32 %v1444_v21 }
 0x98d   : > { %3897 = vrcp.f32 %v1445_v47 }
 0x98e   : > { %3899 = vpow2.f32 %v3291_v20 }
 0x98f   : > { %3901 = vpow2.f32 %v3292_v48 }
 0x996   : > { %v3896_v32 = vpop.eup %3895 }
 0x997   : > { %v3898_v56 = vpop.eup %3897  ;;  %v1452_v9 = vmul.f32 %v3896_v32, %v4478_v61 }
 0x998   : > { %v3900_v12 = vpop.eup %3899  ;;  %v1453_v40 = vmul.f32 %v3898_v56, %v4482_v2 }
 0x999   : > { %v3902_v46 = vpop.eup %3901  ;;  %v1547_v58 = vadd.f32 1.0, %v3900_v12  ;;  %v4597_v12 = vld [vmem:[%s5057_s3] sm:$0xff]  }
 0x99a   : > { %v1548_v13 = vadd.f32 1.0, %v3902_v46  ;;  %v4606_v46 = vld [vmem:[%s5057_s3 + $0x8] sm:$0xff]  }
 0x99b   : > { %3903 = vrcp.f32 %v1547_v58 }
 0x99c   : > { %3905 = vrcp.f32 %v1548_v13 }
 0x9a5   : > { %v3904_v28 = vpop.eup %3903 }
 0x9a6   : > { %v3906_v18 = vpop.eup %3905  ;;  %v1555_v61 = vmul.f32 %v3904_v28, %v4488_v49 }
 0x9a7   : > { %v1556_v2 = vmul.f32 %v3906_v18, %v4492_v55 }
 0x9c0   : > { %v1457_v25 = vpop.permute.xlu0 %1456 }
 0x9c1   : > { %v1462_v22 = vmul.f32 %v3896_v32, %v1457_v25 }
 0x9c2   : > { %v1459_v17 = vpop.permute.xlu1 %1458 }
 0x9c3   : > { %1466 = vrot.lane.b32.xlu0 %v1462_v22, %s4074_s26  ;;  %v1463_v50 = vmul.f32 %v3898_v56, %v1459_v17 }
 0x9c5   : > { %1468 = vrot.lane.b32.xlu1 %v1463_v50, %s4074_s26 }
 0x9f9   : > { %v1560_v60 = vpop.permute.xlu0 %1559 }
 0x9fa   : > { %v1565_v45 = vmul.f32 %v3904_v28, %v1560_v60 }
 0x9fb   : > { %v1562_v31 = vpop.permute.xlu1 %1561 }
 0x9fc   : > { %1569 = vrot.lane.b32.xlu0 %v1565_v45, %s4074_s26  ;;  %v1566_v0 = vmul.f32 %v3906_v18, %v1562_v31 }
 0x9fe   : > { %1571 = vrot.lane.b32.xlu1 %v1566_v0, %s4074_s26 }
 0xa35   : > { %v1467_v24 = vpop.permute.xlu0 %1466 }
 0xa36   : > { %v4552_v15 = vadd.f32 %v1467_v24, %v1452_v9 }
 0xa37   : > { %v1469_v62 = vpop.permute.xlu1 %1468 }
 0xa38   : > { %3907 = vtanh.f32 %v4552_v15  ;;  %v4556_v34 = vadd.f32 %v1469_v62, %v1453_v40 }
 0xa3a   : > { %3909 = vtanh.f32 %v4556_v34 }
 0xa42   : > { %v3908_v3 = vpop.eup %3907 }
 0xa43   : > { %1478 = vrot.lane.b32.xlu0 %v3908_v3, %s4074_s26 }
 0xa44   : > { %v3910_v53 = vpop.eup %3909 }
 0xa45   : > { %1480 = vrot.lane.b32.xlu1 %v3910_v53, %s4074_s26 }
 0xa6e   : > { %v1570_v54 = vpop.permute.xlu0 %1569 }
 0xa6f   : > { %v4562_v6 = vadd.f32 %v1570_v54, %v1555_v61 }
 0xa70   : > { %v1572_v39 = vpop.permute.xlu1 %1571 }
 0xa71   : > { %3911 = vtanh.f32 %v4562_v6  ;;  %v4566_v41 = vadd.f32 %v1572_v39, %v1556_v2 }
 0xa73   : > { %3913 = vtanh.f32 %v4566_v41 }
 0xa7b   : > { %v3912_v11 = vpop.eup %3911 }
 0xa7c   : > { %1581 = vrot.lane.b32.xlu0 %v3912_v11, %s4074_s26 }
 0xa7d   : > { %v3914_v29 = vpop.eup %3913 }
 0xa7e   : > { %1583 = vrot.lane.b32.xlu1 %v3914_v29, %s4074_s26 }
 0xab5   : > { %v1479_v35 = vpop.permute.xlu0 %1478 }
 0xab6   : > { %v4571_v49 = vmul.f32 %v3896_v32, %v1479_v35 }
 0xab7   : > { %v1481_v55 = vpop.permute.xlu1 %1480 }
 0xab8   : > { %v1486_v16 = vmax.f32 %v4499_v36, %v4571_v49  ;;  %v4575_v1 = vmul.f32 %v3898_v56, %v1481_v55 }
 0xaba   : > { %v1487_v21 = vmax.f32 %v4503_v5, %v4575_v1  ;;  %v1594_v47 = vpack.c.bf16 %v4575_v1, %v4571_v49 }
 0xabc   : > { %1596 = vrot.lane.b32.xlu0 %v1594_v47, %s4075_s27 }
 0xaee   : > { %v1582_v25 = vpop.permute.xlu0 %1581 }
 0xaef   : > { %v4582_v22 = vmul.f32 %v3904_v28, %v1582_v25 }
 0xaf0   : > { %v1584_v17 = vpop.permute.xlu1 %1583 }
 0xaf1   : > { %v1589_v32 = vmax.f32 %v4508_v26, %v4582_v22  ;;  %v4586_v50 = vmul.f32 %v3906_v18, %v1584_v17 }
 0xaf3   : > { %v1590_v56 = vmax.f32 %v4512_v30, %v4586_v50  ;;  %v1697_v20 = vpack.c.bf16 %v4586_v50, %v4582_v22 }
 0xaf5   : > { %1699 = vrot.lane.b32.xlu1 %v1697_v20, %s4075_s27 }
 0xb2e   : > { %v1597_v48 = vpop.permute.xlu0 %1596 }
 0xb2f   : > { %3532 = vmatmul.mubr.msk.bf16.vlgmr.msra.gmra.mrb[32].mxu0 %vm581_vm1, %v1597_v48 }
 0xb30   : > { %3544 = vmatpush3.bf16.msra.mxu0 %v4597_v12  ;;  %3547 = vmatprep.mubr.msk.bf16.mxu0 %vm4073_vm0, %v4071_v10 }
 0xb31   : > { %3545 = vmatprep.subr.bf16.mxu0 %v4071_v10 }
 0xb34   : > { %3546 = vmatpush3.bf16.msra.mxu0 %v4606_v46 }
 0xb35   : > { %3559 = vmatprep.subr.bf16.mxu0 %v4071_v10 }
 0xb67   : > { %v1700_v58 = vpop.permute.xlu1 %1699 }
 0xb68   : > { %3540 = vmatmul.mubr.msk.bf16.vlgmr.msra.gmra.mrb[32].mxu1 %vm581_vm1, %v1700_v58 }
 0xb69   : > { %3552 = vmatpush3.bf16.msra.mxu1 %v4519_v42  ;;  %3555 = vmatprep.mubr.msk.bf16.mxu1 %vm4073_vm0, %v4071_v10 }
 0xb6a   : > { %3553 = vmatprep.subr.bf16.mxu1 %v4071_v10 }
 0xb6d   : > { %3554 = vmatpush3.bf16.msra.mxu1 %v4535_v7 }
 0xb6e   : > { %3567 = vmatprep.subr.bf16.mxu1 %v4071_v10 }
 0xc02   : > { %v1635_v13 = vpop.f32.mrb[32].mxu0 }
 0xc03   : > { %v1642_v28 = vadd.f32 %v1635_v13, %v4310_v19  ;;  %v3533_v60 = vpop.f32.mrb[33].mxu0 }
 0xc04   : > { %v1638_v45 = vpop.f32.mrb[34].mxu0 }
 0xc05   : > { %3915 = vtanh.f32 %v1642_v28  ;;  %v1643_v18 = vadd.f32 %v1638_v45, %v4316_v23  ;;  %v3534_v31 = vpop.f32.mrb[35].mxu0  ;;  %v3294_v54 = vmul.f32 -1.442695, %v1642_v28 }
 0xc07   : > { %3917 = vtanh.f32 %v1643_v18  ;;  %v3295_v2 = vmul.f32 -1.442695, %v1643_v18 }
 0xc0f   : > { %v3916_v0 = vpop.eup %3915 }
 0xc10   : > { %1662 = vrot.lane.b32.xlu0 %v3916_v0, %s4074_s26 }
 0xc11   : > { %v3918_v9 = vpop.eup %3917 }
 0xc12   : > { %1664 = vrot.lane.b32.xlu1 %v3918_v9, %s4074_s26 }
 0xc3b   : > { %v1738_v24 = vpop.f32.mrb[32].mxu1 }
 0xc3c   : > { %v1745_v40 = vadd.f32 %v1738_v24, %v4301_v8  ;;  %v3541_v62 = vpop.f32.mrb[33].mxu1 }
 0xc3d   : > { %v1741_v3 = vpop.f32.mrb[34].mxu1 }
 0xc3e   : > { %3919 = vtanh.f32 %v1745_v40  ;;  %v1746_v19 = vadd.f32 %v1741_v3, %v4307_v14  ;;  %v3542_v53 = vpop.f32.mrb[35].mxu1  ;;  %v3297_v20 = vmul.f32 -1.442695, %v1745_v40 }
 0xc40   : > { %3921 = vtanh.f32 %v1746_v19  ;;  %v3298_v48 = vmul.f32 -1.442695, %v1746_v19 }
 0xc41   : > { %3923 = vpow2.f32 %v3294_v54 }
 0xc42   : > { %3925 = vpow2.f32 %v3295_v2 }
 0xc48   : > { %v3920_v61 = vpop.eup %3919 }
 0xc49   : > { %1765 = vrot.lane.b32.xlu0 %v3920_v61, %s4074_s26 }
 0xc4a   : > { %v3922_v23 = vpop.eup %3921 }
 0xc4b   : > { %1767 = vrot.lane.b32.xlu1 %v3922_v23, %s4074_s26  ;;  %v3924_v39 = vpop.eup %3923 }
 0xc4c   : > { %v3926_v11 = vpop.eup %3925  ;;  %v1650_v8 = vadd.f32 1.0, %v3924_v39 }
 0xc4d   : > { %v1651_v29 = vadd.f32 1.0, %v3926_v11 }
 0xc4e   : > { %3927 = vrcp.f32 %v1650_v8 }
 0xc4f   : > { %3929 = vrcp.f32 %v1651_v29 }
 0xc50   : > { %3931 = vpow2.f32 %v3297_v20 }
 0xc51   : > { %3933 = vpow2.f32 %v3298_v48 }
 0xc58   : > { %v3928_v35 = vpop.eup %3927 }
 0xc59   : > { %v3930_v47 = vpop.eup %3929  ;;  %v1658_v40 = vmul.f32 %v3928_v35, %v4552_v15 }
 0xc5a   : > { %v3932_v58 = vpop.eup %3931  ;;  %v1659_v19 = vmul.f32 %v3930_v47, %v4556_v34 }
 0xc5b   : > { %v3934_v13 = vpop.eup %3933  ;;  %v1753_v28 = vadd.f32 1.0, %v3932_v58 }
 0xc5c   : > { %v1754_v60 = vadd.f32 1.0, %v3934_v13 }
 0xc5d   : > { %3935 = vrcp.f32 %v1753_v28 }
 0xc5e   : > { %3937 = vrcp.f32 %v1754_v60 }
 0xc67   : > { %v3936_v45 = vpop.eup %3935 }
 0xc68   : > { %v3938_v0 = vpop.eup %3937  ;;  %v1761_v15 = vmul.f32 %v3936_v45, %v4562_v6 }
 0xc69   : > { %v1762_v34 = vmul.f32 %v3938_v0, %v4566_v41 }
 0xc82   : > { %v1663_v14 = vpop.permute.xlu0 %1662 }
 0xc83   : > { %v1668_v55 = vmul.f32 %v3928_v35, %v1663_v14 }
 0xc84   : > { %v1665_v25 = vpop.permute.xlu1 %1664 }
 0xc85   : > { %1672 = vrot.lane.b32.xlu0 %v1668_v55, %s4074_s26  ;;  %v1669_v17 = vmul.f32 %v3930_v47, %v1665_v25 }
 0xc87   : > { %1674 = vrot.lane.b32.xlu1 %v1669_v17, %s4074_s26 }
 0xcbb   : > { %v1766_v18 = vpop.permute.xlu0 %1765 }
 0xcbc   : > { %v1771_v31 = vmul.f32 %v3936_v45, %v1766_v18 }
 0xcbd   : > { %v1768_v9 = vpop.permute.xlu1 %1767 }
 0xcbe   : > { %1775 = vrot.lane.b32.xlu0 %v1771_v31, %s4074_s26  ;;  %v1772_v24 = vmul.f32 %v3938_v0, %v1768_v9 }
 0xcc0   : > { %1777 = vrot.lane.b32.xlu1 %v1772_v24, %s4074_s26 }
 0xcf7   : > { %v1673_v62 = vpop.permute.xlu0 %1672 }
 0xcf8   : > { %v4630_v3 = vadd.f32 %v1673_v62, %v1658_v40 }
 0xcf9   : > { %v1675_v53 = vpop.permute.xlu1 %1674 }
 0xcfa   : > { %3939 = vtanh.f32 %v4630_v3  ;;  %v4634_v61 = vadd.f32 %v1675_v53, %v1659_v19 }
 0xcfc   : > { %3941 = vtanh.f32 %v4634_v61 }
 0xd04   : > { %v3940_v23 = vpop.eup %3939 }
 0xd05   : > { %1684 = vrot.lane.b32.xlu0 %v3940_v23, %s4074_s26 }
 0xd06   : > { %v3942_v54 = vpop.eup %3941 }
 0xd07   : > { %1686 = vrot.lane.b32.xlu1 %v3942_v54, %s4074_s26 }
 0xd30   : > { %v1776_v2 = vpop.permute.xlu0 %1775 }
 0xd31   : > { %v4640_v39 = vadd.f32 %v1776_v2, %v1761_v15 }
 0xd32   : > { %v1778_v11 = vpop.permute.xlu1 %1777 }
 0xd33   : > { %3943 = vtanh.f32 %v4640_v39  ;;  %v4644_v8 = vadd.f32 %v1778_v11, %v1762_v34 }
 0xd35   : > { %3945 = vtanh.f32 %v4644_v8 }
 0xd3d   : > { %v3944_v29 = vpop.eup %3943 }
 0xd3e   : > { %1787 = vrot.lane.b32.xlu0 %v3944_v29, %s4074_s26 }
 0xd3f   : > { %v3946_v14 = vpop.eup %3945 }
 0xd40   : > { %1789 = vrot.lane.b32.xlu1 %v3946_v14, %s4074_s26 }
 0xd77   : > { %v1685_v55 = vpop.permute.xlu0 %1684 }
 0xd78   : > { %v1690_v6 = vmul.f32 %v3928_v35, %v1685_v55 }
 0xd79   : > { %v1687_v41 = vpop.permute.xlu1 %1686 }
 0xd7a   : > { %v4652_v25 = vmax.f32 %v1486_v16, %v1690_v6  ;;  %v1691_v17 = vmul.f32 %v3930_v47, %v1687_v41 }
 0xd7c   : > { %v4657_v20 = vmax.f32 %v1487_v21, %v1691_v17  ;;  %v1800_v48 = vpack.c.bf16 %v1691_v17, %v1690_v6 }
 0xd7e   : > { %1802 = vrot.lane.b32.xlu0 %v1800_v48, %s4075_s27 }
 0xdb0   : > { %v1788_v58 = vpop.permute.xlu0 %1787 }
 0xdb1   : > { %v1793_v13 = vmul.f32 %v3936_v45, %v1788_v58 }
 0xdb2   : > { %v1790_v36 = vpop.permute.xlu1 %1789 }
 0xdb3   : > { %v4663_v35 = vmax.f32 %v1589_v32, %v1793_v13  ;;  %v1794_v49 = vmul.f32 %v3938_v0, %v1790_v36 }
 0xdb5   : > { %v4668_v16 = vmax.f32 %v1590_v56, %v1794_v49  ;;  %v1903_v5 = vpack.c.bf16 %v1794_v49, %v1793_v13 }
 0xdb7   : > { %1905 = vrot.lane.b32.xlu1 %v1903_v5, %s4075_s27 }
 0xdf0   : > { %v1803_v1 = vpop.permute.xlu0 %1802 }
 0xdf1   : > { %3548 = vmatmul.mubr.msk.bf16.vlgmr.msra.gmra.mrb[36].mxu0 %vm581_vm1, %v1803_v1 }
 0xdf2   : > { %3560 = vmatpush3.bf16.msra.mxu0 %v4597_v12  ;;  %3563 = vmatprep.mubr.msk.bf16.mxu0 %vm4073_vm0, %v4071_v10 }
 0xdf3   : > { %3561 = vmatprep.subr.bf16.mxu0 %v4071_v10 }
 0xdf6   : > { %3562 = vmatpush3.bf16.msra.mxu0 %v4606_v46 }
 0xdf7   : > { %3575 = vmatprep.subr.bf16.mxu0 %v4071_v10 }
 0xe29   : > { %v1906_v26 = vpop.permute.xlu1 %1905 }
 0xe2a   : > { %3556 = vmatmul.mubr.msk.bf16.vlgmr.msra.gmra.mrb[36].mxu1 %vm581_vm1, %v1906_v26 }
 0xe2b   : > { %3568 = vmatpush3.bf16.msra.mxu1 %v4519_v42  ;;  %3571 = vmatprep.mubr.msk.bf16.mxu1 %vm4073_vm0, %v4071_v10 }
 0xe2c   : > { %3569 = vmatprep.subr.bf16.mxu1 %v4071_v10 }
 0xe2f   : > { %3570 = vmatpush3.bf16.msra.mxu1 %v4535_v7 }
 0xe30   : > { %3583 = vmatprep.subr.bf16.mxu1 %v4071_v10 }
 0xec4   : > { %v1841_v30 = vpop.f32.mrb[36].mxu0 }
 0xec5   : > { %v1848_v21 = vadd.f32 %v1841_v30, %v4322_v27  ;;  %v3549_v22 = vpop.f32.mrb[37].mxu0 }
 0xec6   : > { %v1844_v32 = vpop.f32.mrb[38].mxu0 }
 0xec7   : > { %3947 = vtanh.f32 %v1848_v21  ;;  %v1849_v50 = vadd.f32 %v1844_v32, %v4328_v33  ;;  %v3550_v56 = vpop.f32.mrb[39].mxu0  ;;  %v3300_v24 = vmul.f32 -1.442695, %v1848_v21 }
 0xec9   : > { %3949 = vtanh.f32 %v1849_v50  ;;  %v3301_v40 = vmul.f32 -1.442695, %v1849_v50 }
 0xed1   : > { %v3948_v47 = vpop.eup %3947 }
 0xed2   : > { %1868 = vrot.lane.b32.xlu0 %v3948_v47, %s4074_s26 }
 0xed3   : > { %v3950_v28 = vpop.eup %3949 }
 0xed4   : > { %1870 = vrot.lane.b32.xlu1 %v3950_v28, %s4074_s26 }
 0xefd   : > { %v1944_v60 = vpop.f32.mrb[36].mxu1 }
 0xefe   : > { %v1951_v45 = vadd.f32 %v1944_v60, %v4288_v63  ;;  %v3557_v18 = vpop.f32.mrb[37].mxu1 }
 0xeff   : > { %v1947_v31 = vpop.f32.mrb[38].mxu1 }
 0xf00   : > { %3951 = vtanh.f32 %v1951_v45  ;;  %v1952_v27 = vadd.f32 %v1947_v31, %v4294_v4  ;;  %v3558_v0 = vpop.f32.mrb[39].mxu1  ;;  %v3303_v11 = vmul.f32 -1.442695, %v1951_v45 }
 0xf02   : > { %3953 = vtanh.f32 %v1952_v27  ;;  %v3304_v29 = vmul.f32 -1.442695, %v1952_v27 }
 0xf03   : > { %3955 = vpow2.f32 %v3300_v24 }
 0xf04   : > { %3957 = vpow2.f32 %v3301_v40 }
 0xf0a   : > { %v3952_v9 = vpop.eup %3951 }
 0xf0b   : > { %1971 = vrot.lane.b32.xlu0 %v3952_v9, %s4074_s26 }
 0xf0c   : > { %v3954_v33 = vpop.eup %3953 }
 0xf0d   : > { %1973 = vrot.lane.b32.xlu1 %v3954_v33, %s4074_s26  ;;  %v3956_v62 = vpop.eup %3955 }
 0xf0e   : > { %v3958_v19 = vpop.eup %3957  ;;  %v1856_v63 = vadd.f32 1.0, %v3956_v62 }
 0xf0f   : > { %v1857_v53 = vadd.f32 1.0, %v3958_v19 }
 0xf10   : > { %3959 = vrcp.f32 %v1856_v63 }
 0xf11   : > { %3961 = vrcp.f32 %v1857_v53 }
 0xf12   : > { %3963 = vpow2.f32 %v3303_v11 }
 0xf13   : > { %3965 = vpow2.f32 %v3304_v29 }
 0xf1a   : > { %v3960_v23 = vpop.eup %3959 }
 0xf1b   : > { %v3962_v15 = vpop.eup %3961  ;;  %v1864_v5 = vmul.f32 %v3960_v23, %v4630_v3 }
 0xf1c   : > { %v3964_v14 = vpop.eup %3963  ;;  %v1865_v30 = vmul.f32 %v3962_v15, %v4634_v61 }
 0xf1d   : > { %v3966_v55 = vpop.eup %3965  ;;  %v1959_v6 = vadd.f32 1.0, %v3964_v14 }
 0xf1e   : > { %v1960_v41 = vadd.f32 1.0, %v3966_v55 }
 0xf1f   : > { %3967 = vrcp.f32 %v1959_v6 }
 0xf20   : > { %3969 = vrcp.f32 %v1960_v41 }
 0xf29   : > { %v3968_v17 = vpop.eup %3967 }
 0xf2a   : > { %v3970_v13 = vpop.eup %3969  ;;  %v1967_v3 = vmul.f32 %v3968_v17, %v4640_v39 }
 0xf2b   : > { %v1968_v61 = vmul.f32 %v3970_v13, %v4644_v8 }
 0xf44   : > { %v1869_v4 = vpop.permute.xlu0 %1868 }
 0xf45   : > { %v1874_v54 = vmul.f32 %v3960_v23, %v1869_v4 }
 0xf46   : > { %v1871_v2 = vpop.permute.xlu1 %1870 }
 0xf47   : > { %1878 = vrot.lane.b32.xlu0 %v1874_v54, %s4074_s26  ;;  %v1875_v34 = vmul.f32 %v3962_v15, %v1871_v2 }
 0xf49   : > { %1880 = vrot.lane.b32.xlu1 %v1875_v34, %s4074_s26 }
 0xf7d   : > { %v1972_v48 = vpop.permute.xlu0 %1971 }
 0xf7e   : > { %v1977_v58 = vmul.f32 %v3968_v17, %v1972_v48 }
 0xf7f   : > { %v1974_v36 = vpop.permute.xlu1 %1973 }
 0xf80   : > { %1981 = vrot.lane.b32.xlu0 %v1977_v58, %s4074_s26  ;;  %v1978_v49 = vmul.f32 %v3970_v13, %v1974_v36 }
 0xf82   : > { %1983 = vrot.lane.b32.xlu1 %v1978_v49, %s4074_s26 }
 0xfb9   : > { %v1879_v1 = vpop.permute.xlu0 %1878 }
 0xfba   : > { %v4698_v26 = vadd.f32 %v1879_v1, %v1864_v5 }
 0xfbb   : > { %v1881_v21 = vpop.permute.xlu1 %1880 }
 0xfbc   : > { %3971 = vtanh.f32 %v4698_v26  ;;  %v4702_v22 = vadd.f32 %v1881_v21, %v1865_v30 }
 0xfbe   : > { %3973 = vtanh.f32 %v4702_v22 }
 0xfc6   : > { %v3972_v32 = vpop.eup %3971 }
 0xfc7   : > { %1890 = vrot.lane.b32.xlu0 %v3972_v32, %s4074_s26 }
 0xfc8   : > { %v3974_v50 = vpop.eup %3973 }
 0xfc9   : > { %1892 = vrot.lane.b32.xlu1 %v3974_v50, %s4074_s26 }
 0xff2   : > { %v1982_v56 = vpop.permute.xlu0 %1981 }
 0xff3   : > { %v4708_v47 = vadd.f32 %v1982_v56, %v1967_v3 }
 0xff4   : > { %v1984_v28 = vpop.permute.xlu1 %1983 }
 0xff5   : > { %3975 = vtanh.f32 %v4708_v47  ;;  %v4712_v60 = vadd.f32 %v1984_v28, %v1968_v61 }
 0xff7   : > { %3977 = vtanh.f32 %v4712_v60 }
 0xfff   : > { %v3976_v45 = vpop.eup %3975 }
0x1000   : > { %1993 = vrot.lane.b32.xlu0 %v3976_v45, %s4074_s26 }
0x1001   : > { %v3978_v18 = vpop.eup %3977 }
0x1002   : > { %1995 = vrot.lane.b32.xlu1 %v3978_v18, %s4074_s26 }
0x1039   : > { %v1891_v31 = vpop.permute.xlu0 %1890 }
0x103a   : > { %v4717_v39 = vmul.f32 %v3960_v23, %v1891_v31 }
0x103b   : > { %v1893_v8 = vpop.permute.xlu1 %1892 }
0x103c   : > { %v1898_v27 = vmax.f32 %v4652_v25, %v4717_v39  ;;  %v4721_v0 = vmul.f32 %v3962_v15, %v1893_v8 }
0x103e   : > { %v1899_v9 = vmax.f32 %v4657_v20, %v4721_v0  ;;  %v2006_v33 = vpack.c.bf16 %v4721_v0, %v4717_v39 }
0x1040   : > { %2008 = vrot.lane.b32.xlu0 %v2006_v33, %s4075_s27 }
0x1072   : > { %v1994_v24 = vpop.permute.xlu0 %1993 }
0x1073   : > { %v4728_v40 = vmul.f32 %v3968_v17, %v1994_v24 }
0x1074   : > { %v1996_v19 = vpop.permute.xlu1 %1995 }
0x1075   : > { %v2001_v62 = vmax.f32 %v4663_v35, %v4728_v40  ;;  %v4732_v63 = vmul.f32 %v3970_v13, %v1996_v19 }
0x1077   : > { %v2002_v53 = vmax.f32 %v4668_v16, %v4732_v63  ;;  %v2109_v23 = vpack.c.bf16 %v4732_v63, %v4728_v40 }
0x1079   : > { %2111 = vrot.lane.b32.xlu1 %v2109_v23, %s4075_s27 }
0x10b2   : > { %v2009_v4 = vpop.permute.xlu0 %2008 }
0x10b3   : > { %3564 = vmatmul.mubr.msk.bf16.vlgmr.msra.gmra.mrb[40].mxu0 %vm581_vm1, %v2009_v4 }
0x10b4   : > { %3576 = vmatpush3.bf16.msra.mxu0 %v4597_v12  ;;  %3579 = vmatprep.mubr.msk.bf16.mxu0 %vm4073_vm0, %v4071_v10 }
0x10b5   : > { %3577 = vmatprep.subr.bf16.mxu0 %v4071_v10 }
0x10b8   : > { %3578 = vmatpush3.bf16.msra.mxu0 %v4606_v46 }
0x10b9   : > { %3591 = vmatprep.subr.bf16.mxu0 %v4071_v10 }
0x10eb   : > { %v2112_v54 = vpop.permute.xlu1 %2111 }
0x10ec   : > { %3572 = vmatmul.mubr.msk.bf16.vlgmr.msra.gmra.mrb[40].mxu1 %vm581_vm1, %v2112_v54 }
0x10ed   : > { %3584 = vmatpush3.bf16.msra.mxu1 %v4519_v42  ;;  %3587 = vmatprep.mubr.msk.bf16.mxu1 %vm4073_vm0, %v4071_v10 }
0x10ee   : > { %3585 = vmatprep.subr.bf16.mxu1 %v4071_v10 }
0x10f1   : > { %3586 = vmatpush3.bf16.msra.mxu1 %v4535_v7 }
0x10f2   : > { %3603 = vmatprep.subr.bf16.mxu1 %v4071_v10 }
0x1186   : > { %v2047_v12 = vpop.f32.mrb[40].mxu0 }
0x1187   : > { %v2054_v15 = vadd.f32 %v2047_v12, %v4334_v38  ;;  %v3565_v46 = vpop.f32.mrb[41].mxu0 }
0x1188   : > { %v2050_v2 = vpop.f32.mrb[42].mxu0 }
0x1189   : > { %3979 = vtanh.f32 %v2054_v15  ;;  %v2055_v34 = vadd.f32 %v2050_v2, %v4340_v43  ;;  %v3566_v11 = vpop.f32.mrb[43].mxu0  ;;  %v3306_v48 = vmul.f32 -1.442695, %v2054_v15 }
0x118b   : > { %3981 = vtanh.f32 %v2055_v34  ;;  %v3307_v58 = vmul.f32 -1.442695, %v2055_v34 }
0x1193   : > { %v3980_v42 = vpop.eup %3979 }
0x1194   : > { %2074 = vrot.lane.b32.xlu0 %v3980_v42, %s4074_s26 }
0x1195   : > { %v3982_v29 = vpop.eup %3981 }
0x1196   : > { %2076 = vrot.lane.b32.xlu1 %v3982_v29, %s4074_s26 }
0x11bf   : > { %v2150_v14 = vpop.f32.mrb[40].mxu1 }
0x11c0   : > { %v2157_v7 = vadd.f32 %v2150_v14, %v4275_v51  ;;  %v3573_v55 = vpop.f32.mrb[41].mxu1 }
0x11c1   : > { %v2153_v6 = vpop.f32.mrb[42].mxu1 }
0x11c2   : > { %3983 = vtanh.f32 %v2157_v7  ;;  %v2158_v38 = vadd.f32 %v2153_v6, %v4281_v57  ;;  %v3574_v41 = vpop.f32.mrb[43].mxu1  ;;  %v3309_v50 = vmul.f32 -1.442695, %v2157_v7 }
0x11c4   : > { %3985 = vtanh.f32 %v2158_v38  ;;  %v3310_v3 = vmul.f32 -1.442695, %v2158_v38 }
0x11c5   : > { %3987 = vpow2.f32 %v3306_v48 }
0x11c6   : > { %3989 = vpow2.f32 %v3307_v58 }
0x11cc   : > { %v3984_v17 = vpop.eup %3983 }
0x11cd   : > { %2177 = vrot.lane.b32.xlu0 %v3984_v17, %s4074_s26 }
0x11ce   : > { %v3986_v43 = vpop.eup %3985 }
0x11cf   : > { %2179 = vrot.lane.b32.xlu1 %v3986_v43, %s4074_s26  ;;  %v3988_v13 = vpop.eup %3987 }
0x11d0   : > { %v3990_v36 = vpop.eup %3989  ;;  %v2062_v51 = vadd.f32 1.0, %v3988_v13 }
0x11d1   : > { %v2063_v49 = vadd.f32 1.0, %v3990_v36 }
0x11d2   : > { %3991 = vrcp.f32 %v2062_v51 }
0x11d3   : > { %3993 = vrcp.f32 %v2063_v49 }
0x11d4   : > { %3995 = vpow2.f32 %v3309_v50 }
0x11d5   : > { %3997 = vpow2.f32 %v3310_v3 }
0x11dc   : > { %v3992_v5 = vpop.eup %3991 }
0x11dd   : > { %v3994_v30 = vpop.eup %3993  ;;  %v2070_v23 = vmul.f32 %v3992_v5, %v4698_v26 }
0x11de   : > { %v3996_v56 = vpop.eup %3995  ;;  %v2071_v12 = vmul.f32 %v3994_v30, %v4702_v22 }
0x11df   : > { %v3998_v61 = vpop.eup %3997  ;;  %v2165_v28 = vadd.f32 1.0, %v3996_v56 }
0x11e0   : > { %v2166_v45 = vadd.f32 1.0, %v3998_v61 }
0x11e1   : > { %3999 = vrcp.f32 %v2165_v28 }
0x11e2   : > { %4001 = vrcp.f32 %v2166_v45 }
0x11eb   : > { %v4000_v18 = vpop.eup %3999 }
0x11ec   : > { %v4002_v33 = vpop.eup %4001  ;;  %v2173_v26 = vmul.f32 %v4000_v18, %v4708_v47 }
0x11ed   : > { %v2174_v22 = vmul.f32 %v4002_v33, %v4712_v60 }
0x1206   : > { %v2075_v57 = vpop.permute.xlu0 %2074 }
0x1207   : > { %v2080_v1 = vmul.f32 %v3992_v5, %v2075_v57 }
0x1208   : > { %v2077_v21 = vpop.permute.xlu1 %2076 }
0x1209   : > { %2084 = vrot.lane.b32.xlu0 %v2080_v1, %s4074_s26  ;;  %v2081_v32 = vmul.f32 %v3994_v30, %v2077_v21 }
0x120b   : > { %2086 = vrot.lane.b32.xlu1 %v2081_v32, %s4074_s26 }
0x123f   : > { %v2178_v31 = vpop.permute.xlu0 %2177 }
0x1240   : > { %v2183_v8 = vmul.f32 %v4000_v18, %v2178_v31 }
0x1241   : > { %v2180_v24 = vpop.permute.xlu1 %2179 }
0x1242   : > { %2187 = vrot.lane.b32.xlu0 %v2183_v8, %s4074_s26  ;;  %v2184_v19 = vmul.f32 %v4002_v33, %v2180_v24 }
0x1244   : > { %2189 = vrot.lane.b32.xlu1 %v2184_v19, %s4074_s26 }
0x127b   : > { %v2085_v4 = vpop.permute.xlu0 %2084 }
0x127c   : > { %v4766_v54 = vadd.f32 %v2085_v4, %v2070_v23 }
0x127d   : > { %v2087_v15 = vpop.permute.xlu1 %2086 }
0x127e   : > { %4003 = vtanh.f32 %v4766_v54  ;;  %v4770_v46 = vadd.f32 %v2087_v15, %v2071_v12 }
0x1280   : > { %4005 = vtanh.f32 %v4770_v46 }
0x1288   : > { %v4004_v2 = vpop.eup %4003 }
0x1289   : > { %2096 = vrot.lane.b32.xlu0 %v4004_v2, %s4074_s26 }
0x128a   : > { %v4006_v34 = vpop.eup %4005 }
0x128b   : > { %2098 = vrot.lane.b32.xlu1 %v4006_v34, %s4074_s26 }
0x12b4   : > { %v2188_v11 = vpop.permute.xlu0 %2187 }
0x12b5   : > { %v4776_v42 = vadd.f32 %v2188_v11, %v2173_v26 }
0x12b6   : > { %v2190_v29 = vpop.permute.xlu1 %2189 }
0x12b7   : > { %4007 = vtanh.f32 %v4776_v42  ;;  %v4780_v14 = vadd.f32 %v2190_v29, %v2174_v22 }
0x12b9   : > { %4009 = vtanh.f32 %v4780_v14 }
0x12c1   : > { %v4008_v7 = vpop.eup %4007 }
0x12c2   : > { %2199 = vrot.lane.b32.xlu0 %v4008_v7, %s4074_s26 }
0x12c3   : > { %v4010_v55 = vpop.eup %4009 }
0x12c4   : > { %2201 = vrot.lane.b32.xlu1 %v4010_v55, %s4074_s26 }
0x12fb   : > { %v2097_v6 = vpop.permute.xlu0 %2096 }
0x12fc   : > { %v2102_v47 = vmul.f32 %v3992_v5, %v2097_v6 }
0x12fd   : > { %v2099_v60 = vpop.permute.xlu1 %2098 }
0x12fe   : > { %v4788_v38 = vmax.f32 %v1898_v27, %v2102_v47  ;;  %v2103_v41 = vmul.f32 %v3994_v30, %v2099_v60 }
0x1300   : > { %v4793_v17 = vmax.f32 %v1899_v9, %v2103_v41  ;;  %v2212_v43 = vpack.c.bf16 %v2103_v41, %v2102_v47 }
0x1302   : > { %2214 = vrot.lane.b32.xlu0 %v2212_v43, %s4075_s27 }
0x1334   : > { %v2200_v48 = vpop.permute.xlu0 %2199 }
0x1335   : > { %v2205_v58 = vmul.f32 %v4000_v18, %v2200_v48 }
0x1336   : > { %v2202_v25 = vpop.permute.xlu1 %2201 }
0x1337   : > { %v4799_v13 = vmax.f32 %v2001_v62, %v2205_v58  ;;  %v2206_v39 = vmul.f32 %v4002_v33, %v2202_v25 }
0x1339   : > { %v4804_v27 = vmax.f32 %v2002_v53, %v2206_v39  ;;  %v2314_v20 = vpack.c.bf16 %v2206_v39, %v2205_v58 }
0x133b   : > { %2316 = vrot.lane.b32.xlu1 %v2314_v20, %s4075_s27 }
0x1374   : > { %v2215_v0 = vpop.permute.xlu0 %2214 }
0x1375   : > { %3580 = vmatmul.mubr.msk.bf16.vlgmr.msra.gmra.mrb[44].mxu0 %vm581_vm1, %v2215_v0 }
0x1376   : > { %3599 = vmatprep.mubr.msk.bf16.mxu0 %vm4073_vm0, %v4071_v10 }
0x13ad   : > { %v2317_v9 = vpop.permute.xlu1 %2316 }
0x13ae   : > { %3588 = vmatmul.mubr.msk.bf16.vlgmr.msra.gmra.mrb[44].mxu1 %vm581_vm1, %v2317_v9  ;;  %v3751_v9 = vld [vmem:[%s5059_s5 + $0x20] sm:$0xff]  }
0x13af   : > { %3611 = vmatprep.mubr.msk.bf16.mxu1 %vm4073_vm0, %v4071_v10  ;;  %3592 = vmatpush3.bf16.msra.mxu0 %v3751_v9 }
0x13b0   : > { %3593 = vmatprep.subr.bf16.mxu0 %v4071_v10 }
0x1448   : > { %v2253_v35 = vpop.f32.mrb[44].mxu0 }
0x1449   : > { %v2260_v16 = vadd.f32 %v2253_v35, %v4346_v52  ;;  %v3581_v40 = vpop.f32.mrb[45].mxu0  ;;  %v3755_v35 = vld [vmem:[%s5059_s5 + $0x8] sm:$0xff]  }
0x144a   : > { %v2256_v62 = vpop.f32.mrb[46].mxu0 }
0x144b   : > { %v2261_v63 = vadd.f32 %v2256_v62, %v4350_v59  ;;  %v3582_v53 = vpop.f32.mrb[47].mxu0  ;;  %v3312_v50 = vmul.f32 -1.442695, %v2260_v16  ;;  %v3754_v62 = vld [vmem:[%s5059_s5 + $0x30] sm:$0xff]  }
0x144d   : > { %4011 = vtanh.f32 %v2261_v63  ;;  %v3313_v32 = vmul.f32 -1.442695, %v2261_v63  ;;  %v3757_v63 = vld [vmem:[%s5059_s5 + $0x10] sm:$0xff]  }
0x144e   : > { %4013 = vtanh.f32 %v2260_v16 }
0x1457   : > { %v4012_v36 = vpop.eup %4011 }
0x1458   : > { %2282 = vrot.lane.b32.xlu0 %v4012_v36, %s4074_s26  ;;  %v4014_v51 = vpop.eup %4013 }
0x145c   : > { %2280 = vrot.lane.b32.xlu0 %v4014_v51, %s4074_s26 }
0x1481   : > { %v2355_v49 = vpop.f32.mrb[44].mxu1 }
0x1482   : > { %v2362_v5 = vadd.f32 %v2355_v49, %v4259_v37  ;;  %v3589_v57 = vpop.f32.mrb[45].mxu1  ;;  %v3756_v49 = vld [vmem:[%s5059_s5 + $0x38] sm:$0xff]  }
0x1483   : > { %v2358_v1 = vpop.f32.mrb[46].mxu1 }
0x1484   : > { %v2363_v52 = vadd.f32 %v2358_v1, %v4265_v44  ;;  %v3590_v30 = vpop.f32.mrb[47].mxu1  ;;  %v3315_v24 = vmul.f32 -1.442695, %v2362_v5 }
0x1486   : > { %4015 = vtanh.f32 %v2363_v52  ;;  %v3316_v33 = vmul.f32 -1.442695, %v2363_v52 }
0x1487   : > { %4017 = vtanh.f32 %v2362_v5 }
0x1488   : > { %4019 = vpow2.f32 %v3313_v32 }
0x1489   : > { %4021 = vpow2.f32 %v3312_v50 }
0x1490   : > { %v4016_v59 = vpop.eup %4015 }
0x1491   : > { %2384 = vrot.lane.b32.xlu1 %v4016_v59, %s4074_s26  ;;  %v4018_v21 = vpop.eup %4017 }
0x1492   : > { %v4020_v3 = vpop.eup %4019 }
0x1493   : > { %v2269_v56 = vadd.f32 1.0, %v4020_v3  ;;  %v4022_v37 = vpop.eup %4021  ;;  %v3759_v3 = vld [vmem:[%s5059_s5 + $0x40] sm:$0xff]  }
0x1494   : > { %v2268_v61 = vadd.f32 1.0, %v4022_v37 }
0x1495   : > { %2382 = vrot.lane.b32.xlu1 %v4018_v21, %s4074_s26  ;;  %4023 = vrcp.f32 %v2269_v56 }
0x1496   : > { %4025 = vrcp.f32 %v2268_v61  ;;  %v3760_v61 = vld [vmem:[%s5059_s5 + $0x48] sm:$0xff]  }
0x1497   : > { %4027 = vpow2.f32 %v3316_v33 }
0x1498   : > { %4029 = vpow2.f32 %v3315_v24  ;;  %v3766_v24 = vld [vmem:[%s5059_s5 + $0x78] sm:$0xff]  }
0x149f   : > { %v4024_v44 = vpop.eup %4023 }
0x14a0   : > { %v4822_v18 = vpop.eup %4025  ;;  %v2277_v29 = vmul.f32 %v4024_v44, %v4770_v46 }
0x14a1   : > { %v4028_v19 = vpop.eup %4027  ;;  %v2276_v6 = vmul.f32 %v4822_v18, %v4766_v54 }
0x14a2   : > { %v2371_v23 = vadd.f32 1.0, %v4028_v19  ;;  %v4030_v4 = vpop.eup %4029  ;;  %v3767_v19 = vld [vmem:[%s5061_s7 + $0x20] sm:$0xff]  }
0x14a3   : > { %v2370_v12 = vadd.f32 1.0, %v4030_v4 }
0x14a4   : > { %4031 = vrcp.f32 %v2371_v23 }
0x14a5   : > { %4033 = vrcp.f32 %v2370_v12  ;;  %v3768_v12 = vld [vmem:[%s5061_s7 + $0x28] sm:$0xff]  }
0x14ae   : > { %v4826_v15 = vpop.eup %4031 }
0x14af   : > { %v4830_v26 = vpop.eup %4033  ;;  %v2379_v48 = vmul.f32 %v4826_v15, %v4780_v14  ;;  %v3753_v14 = vld [vmem:[%s5059_s5] sm:$0xff]  }
0x14b0   : > { %v2378_v25 = vmul.f32 %v4830_v26, %v4776_v42  ;;  %v3752_v42 = vld [vmem:[%s5059_s5 + $0x28] sm:$0xff]   ;;  %3604 = vmatpush3.bf16.msra.mxu1 %v3753_v14 }
0x14b1   : > { %3605 = vmatprep.subr.bf16.mxu1 %v4071_v10  ;;  %3594 = vmatpush3.bf16.msra.mxu0 %v3752_v42 }
0x14b2   : > { %3595 = vmatprep.subr.bf16.mxu0 %v4071_v10 }
0x14b4   : > { %3606 = vmatpush3.bf16.msra.mxu1 %v3755_v35 }
0x14b5   : > { %3607 = vmatprep.subr.bf16.mxu1 %v4071_v10  ;;  %3596 = vmatpush3.bf16.msra.mxu0 %v3754_v62 }
0x14b6   : > { %3597 = vmatprep.subr.bf16.mxu0 %v4071_v10 }
0x14b8   : > { %3608 = vmatpush3.bf16.msra.mxu1 %v3757_v63 }
0x14b9   : > { %3609 = vmatprep.subr.bf16.mxu1 %v4071_v10  ;;  %3598 = vmatpush3.bf16.msra.mxu0 %v3756_v49 }
0x14ba   : > { %3615 = vmatprep.subr.bf16.mxu0 %v4071_v10 }
0x14ca   : > { %v2283_v28 = vpop.permute.xlu0 %2282 }
0x14cb   : > { %v2287_v45 = vmul.f32 %v4024_v44, %v2283_v28 }
0x14cd   : > { %2292 = vrot.lane.b32.xlu0 %v2287_v45, %s4074_s26  ;;  %v3762_v45 = vld [vmem:[%s5059_s5 + $0x50] sm:$0xff]  }
0x14ce   : > { %v2281_v31 = vpop.permute.xlu0 %2280 }
0x14cf   : > { %v2286_v8 = vmul.f32 %v4822_v18, %v2281_v31  ;;  %v3764_v31 = vld [vmem:[%s5059_s5 + $0x58] sm:$0xff]  }
0x14d1   : > { %2290 = vrot.lane.b32.xlu0 %v2286_v8, %s4074_s26  ;;  %v3765_v8 = vld [vmem:[%s5059_s5 + $0x70] sm:$0xff]  }
0x1503   : > { %v2385_v2 = vpop.permute.xlu1 %2384 }
0x1504   : > { %v2389_v34 = vmul.f32 %v4826_v15, %v2385_v2 }
0x1506   : > { %2394 = vrot.lane.b32.xlu1 %v2389_v34, %s4074_s26  ;;  %v3770_v34 = vld [vmem:[%s5061_s7 + $0x30] sm:$0xff]  }
0x1507   : > { %v2383_v11 = vpop.permute.xlu1 %2382 }
0x1508   : > { %v2388_v22 = vmul.f32 %v4830_v26, %v2383_v11  ;;  %v3772_v11 = vld [vmem:[%s5061_s7 + $0x38] sm:$0xff]  }
0x150a   : > { %2392 = vrot.lane.b32.xlu1 %v2388_v22, %s4074_s26  ;;  %v3773_v22 = vld [vmem:[%s5061_s7 + $0x10] sm:$0xff]  }
0x153f   : > { %v2293_v7 = vpop.permute.xlu0 %2292 }
0x1540   : > { %v2297_v55 = vadd.f32 %v2293_v7, %v2277_v29  ;;  %v3774_v29 = vld [vmem:[%s5061_s7 + $0x18] sm:$0xff]   ;;  %v3775_v7 = vld [vmem:[%s5061_s7 + $0x40] sm:$0xff]  }
0x1542   : > { %4035 = vtanh.f32 %v2297_v55  ;;  %v3776_v55 = vld [vmem:[%s5061_s7 + $0x48] sm:$0xff]  }
0x1543   : > { %v2291_v47 = vpop.permute.xlu0 %2290 }
0x1544   : > { %v2296_v60 = vadd.f32 %v2291_v47, %v2276_v6  ;;  %v3777_v6 = vld [vmem:[%s5061_s7 + $0x60] sm:$0xff]   ;;  %v3778_v47 = vld [vmem:[%s5061_s7 + $0x50] sm:$0xff]  }
0x1546   : > { %4037 = vtanh.f32 %v2296_v60  ;;  %v3779_v60 = vld [vmem:[%s5061_s7 + $0x68] sm:$0xff]  }
0x154c   : > { %v4036_v41 = vpop.eup %4035 }
0x154d   : > { %2304 = vrot.lane.b32.xlu0 %v4036_v41, %s4074_s26  ;;  %v3780_v41 = vld [vmem:[%s5061_s7 + $0x58] sm:$0xff]  }
0x1550   : > { %v4038_v43 = vpop.eup %4037 }
0x1551   : > { %2302 = vrot.lane.b32.xlu0 %v4038_v43, %s4074_s26  ;;  %v3781_v43 = vld [vmem:[%s5061_s7 + $0x70] sm:$0xff]  }
0x1578   : > { %v2395_v58 = vpop.permute.xlu1 %2394 }
0x1579   : > { %v2399_v46 = vadd.f32 %v2395_v58, %v2379_v48  ;;  %v3782_v48 = vld [vmem:[%s5061_s7 + $0x78] sm:$0xff]   ;;  %v3783_v58 = vld [vmem:[%s5061_s7 + $0x80] sm:$0xff]  }
0x157b   : > { %4039 = vtanh.f32 %v2399_v46  ;;  %v3784_v46 = vld [vmem:[%s5061_s7 + $0x88] sm:$0xff]  }
0x157c   : > { %v2393_v39 = vpop.permute.xlu1 %2392 }
0x157d   : > { %v2398_v54 = vadd.f32 %v2393_v39, %v2378_v25 }
0x157f   : > { %4041 = vtanh.f32 %v2398_v54 }
0x1585   : > { %v4040_v20 = vpop.eup %4039 }
0x1586   : > { %2406 = vrot.lane.b32.xlu1 %v4040_v20, %s4074_s26 }
0x1589   : > { %v4042_v0 = vpop.eup %4041 }
0x158a   : > { %2404 = vrot.lane.b32.xlu1 %v4042_v0, %s4074_s26 }
0x15bf   : > { %v2305_v16 = vpop.permute.xlu0 %2304 }
0x15c0   : > { %v2309_v40 = vmul.f32 %v4024_v44, %v2305_v16  ;;  %v3761_v44 = vld [vmem:[%s5059_s5 + $0x60] sm:$0xff]  }
0x15c2   : > { %v2311_v53 = vmax.f32 %v4793_v17, %v2309_v40  ;;  %v3758_v17 = vld [vmem:[%s5059_s5 + $0x18] sm:$0xff]  }
0x15c3   : > { %v2303_v36 = vpop.permute.xlu0 %2302  ;;  %3610 = vmatpush3.bf16.msra.mxu1 %v3758_v17 }
0x15c4   : > { %v2308_v51 = vmul.f32 %v4822_v18, %v2303_v36  ;;  %2418 = vrot.lane.b32.xlu0 %v2311_v53, %s4075_s27  ;;  %3627 = vmatprep.subr.bf16.mxu1 %v4071_v10  ;;  %v3763_v18 = vld [vmem:[%s5059_s5 + $0x68] sm:$0xff]  }
0x15c6   : > { %v2310_v5 = vmax.f32 %v4788_v38, %v2308_v51  ;;  %v3337_v51 = vld [vmem:[%s5060_s6] ss:$0 sm:$0xff] }
0x15c8   : > { %2416 = vrot.lane.b32.xlu0 %v2310_v5, %s4075_s27 }
0x15f8   : > { %v2407_v57 = vpop.permute.xlu1 %2406 }
0x15f9   : > { %v2411_v1 = vmul.f32 %v4826_v15, %v2407_v57  ;;  %v3769_v15 = vld [vmem:[%s5061_s7] sm:$0xff]  }
0x15fb   : > { %v2413_v52 = vmax.f32 %v4804_v27, %v2411_v1 }
0x15fc   : > { %v2405_v38 = vpop.permute.xlu1 %2404 }
0x15fd   : > { %v2410_v30 = vmul.f32 %v4830_v26, %v2405_v38  ;;  %2426 = vrot.lane.b32.xlu1 %v2413_v52, %s4076_s25  ;;  %v3771_v26 = vld [vmem:[%s5061_s7 + $0x8] sm:$0xff]  }
0x15ff   : > { %v2412_v59 = vmax.f32 %v4799_v13, %v2410_v30 }
0x1601   : > { %2424 = vrot.lane.b32.xlu1 %v2412_v59, %s4076_s25 }
0x1636   : > { %v2419_v21 = vpop.permute.xlu0 %2418 }
0x163a   : > { %v2417_v27 = vpop.permute.xlu0 %2416 }
0x166f   : > { %v2427_v32 = vpop.permute.xlu1 %2426 }
0x1670   : > { %v2431_v50 = vsel %vm581_vm1, %v2419_v21, %v2427_v32 }
0x1671   : > { %v4890_v56 = vpack.c.bf16 %v2431_v50, %v2431_v50 }
0x1673   : > { %3600 = vmatmul.mubr.msk.bf16.vlgmr.msra.gmra.mrb[48].mxu0 %vm2492_vm2, %v4890_v56  ;;  %v2425_v37 = vpop.permute.xlu1 %2424 }
0x1674   : > { %3616 = vmatpush3.bf16.msra.mxu0 %v3759_v3  ;;  %v2430_v13 = vsel %vm581_vm1, %v2417_v27, %v2425_v37  ;;  %3623 = vmatprep.mubr.msk.bf16.mxu0 %vm4073_vm0, %v4071_v10 }
0x1675   : > { %v2466_v28 = vpack.c.bf16 %v2430_v13, %v2430_v13  ;;  %3617 = vmatprep.subr.bf16.mxu0 %v4071_v10  ;;  %v2432_v33 = vsub.f32 %v2430_v13, %v2431_v50  ;;  %v2433_v23 = vmul.f32 %v2431_v50, %v2430_v13 }
0x1677   : > { %3612 = vmatmul.mubr.msk.bf16.vlgmr.msra.gmra.mrb[48].mxu1 %vm2492_vm2, %v2466_v28  ;;  %v2603_v4 = vpack.c.bf16 %v2432_v33, %v2432_v33  ;;  %v2672_v2 = vpack.c.bf16 %v2433_v23, %v2433_v23  ;;  %v3786_v23 = vld [vmem:[%s5063_s9 + $0x8] sm:$0xff]  }
0x1678   : > { %3618 = vmatpush3.bf16.msra.mxu0 %v3760_v61  ;;  %3628 = vmatpush3.bf16.msra.mxu1 %v3761_v44 }
0x1679   : > { %3619 = vmatprep.subr.bf16.mxu0 %v4071_v10  ;;  %3629 = vmatprep.subr.bf16.mxu1 %v4071_v10 }
0x167a   : > { %3635 = vmatprep.mubr.msk.bf16.mxu1 %vm4073_vm0, %v4071_v10 }
0x167c   : > { %3620 = vmatpush3.bf16.msra.mxu0 %v3762_v45  ;;  %3630 = vmatpush3.bf16.msra.mxu1 %v3763_v18 }
0x167d   : > { %3621 = vmatprep.subr.bf16.mxu0 %v4071_v10  ;;  %3631 = vmatprep.subr.bf16.mxu1 %v4071_v10 }
0x1680   : > { %3622 = vmatpush3.bf16.msra.mxu0 %v3764_v31  ;;  %3632 = vmatpush3.bf16.msra.mxu1 %v3765_v8 }
0x1681   : > { %3633 = vmatprep.subr.bf16.mxu1 %v4071_v10  ;;  %3639 = vmatprep.subr.bf16.mxu0 %v4071_v10 }
0x1683   : > { %3624 = vmatmul.mubr.msk.bf16.vlgmr.msra.gmra.mrb[52].mxu0 %vm2492_vm2, %v2603_v4 }
0x1684   : > { %3634 = vmatpush3.bf16.msra.mxu1 %v3766_v24  ;;  %3640 = vmatpush3.bf16.msra.mxu0 %v3767_v19  ;;  %v3785_v19 = vld [vmem:[%s5063_s9] sm:$0xff]  }
0x1685   : > { %3641 = vmatprep.subr.bf16.mxu0 %v4071_v10  ;;  %3651 = vmatprep.subr.bf16.mxu1 %v4071_v10 }
0x1686   : > { %3647 = vmatprep.mubr.msk.bf16.mxu0 %vm4073_vm0, %v4071_v10 }
0x1687   : > { %3636 = vmatmul.mubr.msk.bf16.vlgmr.msra.gmra.mrb[52].mxu1 %vm2492_vm2, %v2672_v2 }
0x1688   : > { %3642 = vmatpush3.bf16.msra.mxu0 %v3768_v12  ;;  %3652 = vmatpush3.bf16.msra.mxu1 %v3769_v15  ;;  %v3361_v12 = vld [vmem:[%s5062_s8] ss:$0 sm:$0xff] }
0x1689   : > { %3643 = vmatprep.subr.bf16.mxu0 %v4071_v10  ;;  %3653 = vmatprep.subr.bf16.mxu1 %v4071_v10 }
0x168a   : > { %3659 = vmatprep.mubr.msk.bf16.mxu1 %vm4073_vm0, %v4071_v10 }
0x168c   : > { %3644 = vmatpush3.bf16.msra.mxu0 %v3770_v34  ;;  %3654 = vmatpush3.bf16.msra.mxu1 %v3771_v26 }
0x168d   : > { %3645 = vmatprep.subr.bf16.mxu0 %v4071_v10  ;;  %3655 = vmatprep.subr.bf16.mxu1 %v4071_v10 }
0x1690   : > { %3646 = vmatpush3.bf16.msra.mxu0 %v3772_v11  ;;  %3656 = vmatpush3.bf16.msra.mxu1 %v3773_v22 }
0x1691   : > { %3657 = vmatprep.subr.bf16.mxu1 %v4071_v10  ;;  %3663 = vmatprep.subr.bf16.mxu0 %v4071_v10 }
0x1693   : > { %3648 = vmatmul.mubr.msk.bf16.vlgmr.msra.gmra.mrb[56].mxu0 %vm2492_vm2, %v4890_v56 }
0x1694   : > { %3658 = vmatpush3.bf16.msra.mxu1 %v3774_v29  ;;  %3664 = vmatpush3.bf16.msra.mxu0 %v3775_v7 }
0x1695   : > { %3665 = vmatprep.subr.bf16.mxu0 %v4071_v10  ;;  %3675 = vmatprep.subr.bf16.mxu1 %v4071_v10 }
0x1696   : > { %3671 = vmatprep.mubr.msk.bf16.mxu0 %vm4073_vm0, %v4071_v10 }
0x1697   : > { %3660 = vmatmul.mubr.msk.bf16.vlgmr.msra.gmra.mrb[56].mxu1 %vm2492_vm2, %v2466_v28 }
0x1698   : > { %3666 = vmatpush3.bf16.msra.mxu0 %v3776_v55  ;;  %3676 = vmatpush3.bf16.msra.mxu1 %v3777_v6 }
0x1699   : > { %3667 = vmatprep.subr.bf16.mxu0 %v4071_v10  ;;  %3677 = vmatprep.subr.bf16.mxu1 %v4071_v10 }
0x169a   : > { %3683 = vmatprep.mubr.msk.bf16.mxu1 %vm4073_vm0, %v4071_v10 }
0x169c   : > { %3668 = vmatpush3.bf16.msra.mxu0 %v3778_v47  ;;  %3678 = vmatpush3.bf16.msra.mxu1 %v3779_v60 }
0x169d   : > { %3669 = vmatprep.subr.bf16.mxu0 %v4071_v10  ;;  %3679 = vmatprep.subr.bf16.mxu1 %v4071_v10 }
0x16a0   : > { %3670 = vmatpush3.bf16.msra.mxu0 %v3780_v41  ;;  %3680 = vmatpush3.bf16.msra.mxu1 %v3781_v43 }
0x16a1   : > { %3681 = vmatprep.subr.bf16.mxu1 %v4071_v10  ;;  %3687 = vmatprep.subr.bf16.mxu0 %v4071_v10 }
0x16a3   : > { %3672 = vmatmul.mubr.msk.bf16.vlgmr.msra.gmra.mrb[60].mxu0 %vm2492_vm2, %v2603_v4 }
0x16a4   : > { %3682 = vmatpush3.bf16.msra.mxu1 %v3782_v48  ;;  %3691 = vmatprep.mubr.msk.bf16.mxu0 %vm4073_vm0, %v4071_v10 }
0x16a5   : > { %3695 = vmatprep.subr.bf16.mxu1 %v4071_v10  ;;  %3688 = vmatpush3.bf16.msra.mxu0 %v3783_v58 }
0x16a6   : > { %3689 = vmatprep.subr.bf16.mxu0 %v4071_v10 }
0x16a7   : > { %3684 = vmatmul.mubr.msk.bf16.vlgmr.msra.gmra.mrb[60].mxu1 %vm2492_vm2, %v2672_v2 }
0x16a8   : > { %3699 = vmatprep.mubr.msk.bf16.mxu1 %vm4073_vm0, %v4071_v10  ;;  %3696 = vmatpush3.bf16.msra.mxu1 %v3785_v19 }
0x16a9   : > { %3690 = vmatpush3.bf16.msra.mxu0 %v3784_v46  ;;  %3697 = vmatprep.subr.bf16.mxu1 %v4071_v10  ;;  %v3362_v10 = vld [vmem:[%s5064_s10] ss:$0 sm:$0xff] }
0x16ac   : > { %3698 = vmatpush3.bf16.msra.mxu1 %v3786_v23 }
0x1746   : > { %v2530_v25 = vpop.f32.mrb[48].mxu0 }
0x1747   : > { %v3601_v39 = vpop.f32.mrb[49].mxu0 }
0x1748   : > { %v2533_v54 = vpop.f32.mrb[50].mxu0 }
0x1749   : > { %v3602_v20 = vpop.f32.mrb[51].mxu0 }
0x174a   : > { %v2597_v0 = vpop.f32.mrb[48].mxu1 }
0x174b   : > { %v2598_v9 = vadd.f32 %v2597_v0, %v2530_v25  ;;  %v3613_v14 = vpop.f32.mrb[49].mxu1 }
0x174c   : > { %v2600_v42 = vpop.f32.mrb[50].mxu1 }
0x174d   : > { %v3614_v35 = vpop.f32.mrb[51].mxu1 }
0x1756   : > { %v2665_v16 = vpop.f32.mrb[52].mxu0 }
0x1757   : > { %v2671_v40 = vadd.f32 %v2665_v16, %v2598_v9  ;;  %v3625_v62 = vpop.f32.mrb[53].mxu0 }
0x1758   : > { %v2668_v63 = vpop.f32.mrb[54].mxu0 }
0x1759   : > { %v3626_v53 = vpop.f32.mrb[55].mxu0 }
0x175a   : > { %v2734_v36 = vpop.f32.mrb[52].mxu1 }
0x175b   : > { %v2740_v49 = vadd.f32 %v2734_v36, %v2671_v40  ;;  %v3637_v5 = vpop.f32.mrb[53].mxu1 }
0x175c   : > { %v2737_v17 = vpop.f32.mrb[54].mxu1 }
0x175d   : > { %v2748_v57 = vadd.f32 %v3337_v51, %v2740_v49  ;;  %v3638_v1 = vpop.f32.mrb[55].mxu1 }
0x175f   : > { %v2749_v52 = vmax.f32 %v2748_v57, 0.0 }
0x1761   : > { %v3044_v38 = vpack.c.bf16 %v2749_v52, %v2749_v52 }
0x1763   : > { %3692 = vmatmul.mubr.msk.bf16.vlgmr.msra.gmra.mrb[64].mxu0 %vm581_vm1, %v3044_v38 }
0x1766   : > { %v2844_v30 = vpop.f32.mrb[56].mxu0 }
0x1767   : > { %v3649_v59 = vpop.f32.mrb[57].mxu0 }
0x1768   : > { %v2847_v21 = vpop.f32.mrb[58].mxu0 }
0x1769   : > { %v3650_v32 = vpop.f32.mrb[59].mxu0 }
0x176a   : > { %v2908_v50 = vpop.f32.mrb[56].mxu1 }
0x176b   : > { %v2909_v3 = vadd.f32 %v2908_v50, %v2844_v30  ;;  %v3661_v56 = vpop.f32.mrb[57].mxu1 }
0x176c   : > { %v2911_v27 = vpop.f32.mrb[58].mxu1 }
0x176d   : > { %v3662_v37 = vpop.f32.mrb[59].mxu1 }
0x1776   : > { %v2972_v13 = vpop.f32.mrb[60].mxu0 }
0x1777   : > { %v2978_v61 = vadd.f32 %v2972_v13, %v2909_v3  ;;  %v3673_v44 = vpop.f32.mrb[61].mxu0 }
0x1778   : > { %v2975_v28 = vpop.f32.mrb[62].mxu0 }
0x1779   : > { %v3674_v45 = vpop.f32.mrb[63].mxu0 }
0x177a   : > { %v3037_v18 = vpop.f32.mrb[60].mxu1 }
0x177b   : > { %v3043_v31 = vadd.f32 %v3037_v18, %v2978_v61  ;;  %v3685_v8 = vpop.f32.mrb[61].mxu1 }
0x177c   : > { %v3040_v33 = vpop.f32.mrb[62].mxu1 }
0x177d   : > { %v3686_v24 = vpop.f32.mrb[63].mxu1 }
0x1836   : > { %v3094_v4 = vpop.f32.mrb[64].mxu0 }
0x1837   : > { %v3100_v15 = vadd.f32 %v3094_v4, %v3043_v31  ;;  %v3693_v2 = vpop.f32.mrb[65].mxu0 }
0x1838   : > { %v3097_v34 = vpop.f32.mrb[66].mxu0 }
0x1839   : > { %v3108_v26 = vadd.f32 %v3361_v12, %v3100_v15  ;;  %v3694_v11 = vpop.f32.mrb[67].mxu0 }
0x183b   : > { %v3109_v22 = vmax.f32 %v3108_v26, 0.0 }
0x183d   : > { %v3114_v29 = vpack.c.bf16 %v3109_v22, %v3109_v22 }
0x183f   : > { %3700 = vmatmul.mubr.msk.bf16.vlgmr.msra.gmra.mrb[64].mxu1 %vm581_vm1, %v3114_v29 }
0x1912   : > { %v3171_v7 = vpop.f32.mrb[64].mxu1 }
0x1913   : > { %v3172_v55 = vadd.f32 %v3362_v10, %v3171_v7  ;;  %v3701_v6 = vpop.f32.mrb[65].mxu1 }
0x1914   : > { %v3174_v47 = vpop.f32.mrb[66].mxu1 }
0x1915   : > { %3177 = vst [vmem:[%s487_s15] sm:$0xff] %v3172_v55  ;;  %v3702_v60 = vpop.f32.mrb[67].mxu1 }
0x1916 PF: > { %p18_p9 = scmp.ge.s32.totalorder %s4154_s21, 4   ;;  %s5066_s17 = smov %s4065_s18 }
0x1917   : > { %s5067_s18 = smov %s4163_s24  ;;  %s5068_s19 = smov %s4154_s21 }
0x1918   :  { %20 = sbr.rel (!%p18_p9) target bundleno = 2 (0x2), region = 154 }

</bundles_post_ra>
